<compile_context>
chip_gen: v7x
topology: tpu7x:2x2x1
jax: 0.10.0
libtpu: 0.0.40
codegen_flags: <defaults>
</compile_context>

<pallas_src>
import math

import jax
import jax.numpy as jnp
from jax import lax
from jax.experimental import pallas as pl
from jax.experimental.pallas import tpu as pltpu


def _layer_norm(x, gamma, beta=None, eps=1e-5):
    """LayerNorm over the last axis; one-pass statistics (E[x^2] - E[x]^2)."""
    mu = jnp.mean(x, axis=-1, keepdims=True)
    ms = jnp.mean(x * x, axis=-1, keepdims=True)
    var = jnp.maximum(ms - mu * mu, 0.0)
    y = (x - mu) * lax.rsqrt(var + eps) * gamma
    if beta is not None:
        y = y + beta
    return y


def _layer_norm_ref(x, gamma, beta=None, eps=1e-5):
    """Two-pass LayerNorm mirroring torch.nn.LayerNorm (reference only)."""
    mu = jnp.mean(x, axis=-1, keepdims=True)
    var = jnp.mean(jnp.square(x - mu), axis=-1, keepdims=True)
    y = (x - mu) * lax.rsqrt(var + eps) * gamma
    if beta is not None:
        y = y + beta
    return y


def _make_kernel(n_heads, d_head):
    H, dh = n_heads, d_head

    def split_heads(t):
        """(M, H*dh) -> (H, M, dh) via one reshape + one layout-aware permute."""
        m = t.shape[0]
        t3 = t.reshape(m, H, dh)
        if hasattr(pltpu, "einshape"):
            return pltpu.einshape("mhd->hmd", t3)
        return jnp.transpose(t3, (1, 0, 2))

    def merge_heads(t):
        """(H, M, dh) -> (M, H*dh)."""
        m = t.shape[1]
        if hasattr(pltpu, "einshape"):
            t3 = pltpu.einshape("hmd->mhd", t)
        else:
            t3 = jnp.transpose(t, (1, 0, 2))
        return t3.reshape(m, H * dh)

    def kernel(x_ref, segr_ref, segc_ref, ln_w_ref, ln_b_ref, wqkv_ref,
               qln_w_ref, kln_w_ref, wout_ref, o_ref):
        bb, L, D = x_ref.shape                     # static block shape
        M = bb * L
        x = x_ref[...].reshape(M, D)               # flat rows of this block

        # layernorm_qkv = LayerNorm(D) -> Linear(D, 3D, bias=False).
        # bf16 MXU operands, f32 accumulation.
        xn = _layer_norm(x, ln_w_ref[0], ln_b_ref[0]).astype(jnp.bfloat16)
        qkv = jnp.dot(xn, wqkv_ref[...],
                      preferred_element_type=jnp.float32)          # (M, 3D)
        q = qkv[:, :D]
        k = qkv[:, D:2 * D]
        v = qkv[:, 2 * D:]

        # q_ln / k_ln: LayerNorm(D, bias=False).  The 1/sqrt(d_head) attention
        # scale is folded into the q_ln gamma in the wrapper.
        q = _layer_norm(q, qln_w_ref[0]).astype(jnp.bfloat16)
        k = _layer_norm(k, kln_w_ref[0]).astype(jnp.bfloat16)
        v = v.astype(jnp.bfloat16)

        qh = split_heads(q)                        # (H, M, dh)
        kh = split_heads(k)
        vh = split_heads(v)

        # Scores (H, M, M), f32 MXU accumulation (scale already folded).
        s = lax.dot_general(qh, kh, (((2,), (2,)), ((0,), (0,))),
                            preferred_element_type=jnp.float32)

        # Additive mask: attend only within the same (batch-row, segment); the
        # keys are pre-combined in the wrapper.  The diagonal is always
        # unmasked so every softmax row has denom >= 1.
        allowed = segc_ref[0] == segr_ref[0]       # (M, 1) == (1, M) -> (M, M)
        bias = jnp.where(allowed, jnp.float32(0.0), jnp.float32(-1e30))
        s = s + bias[None]

        # Softmax: f32 max-subtraction, bf16 exp (argument <= 0), denominator
        # accumulated in f32 by the PV matmul below.
        mrow = jnp.max(s, axis=-1, keepdims=True)            # (H, M, 1)
        p = jnp.exp((s - mrow).astype(jnp.bfloat16))          # (H, M, M) bf16

        # Append a ones column to V so the row sum rides along on the MXU
        # instead of a cross-lane XLU reduce over (H, M, M).
        vh1 = jnp.concatenate(
            [vh, jnp.ones((H, M, 1), jnp.bfloat16)], axis=-1)  # (H, M, dh+1)
        ctx1 = lax.dot_general(p, vh1, (((2,), (1,)), ((0,), (0,))),
                               preferred_element_type=jnp.float32)
        ctx = ctx1[..., :dh]                                  # (H, M, dh) f32
        denom = ctx1[..., dh:dh + 1]                          # (H, M, 1)  f32

        inv = pl.reciprocal(denom, approx=True)               # EUP slot
        ctx = (ctx * inv).astype(jnp.bfloat16)

        # out_proj as a single K = H*dh = D contraction on the MXU.
        ctx2 = merge_heads(ctx)                               # (M, D) bf16
        out = jnp.dot(ctx2, wout_ref[...],
                      preferred_element_type=jnp.float32)     # (M, D) f32
        o_ref[...] = out.reshape(bb, L, D).astype(o_ref.dtype)

    return kernel


def _step_vmem_bytes(bb, L, n_heads, d_model):
    """Rough per-grid-step VMEM live-set estimate (bytes)."""
    M = bb * L
    scores = n_heads * M * M * 4            # f32 scores
    probs = n_heads * M * M * 2             # bf16 probabilities
    mask = M * M * 4                        # f32 additive bias
    qkv = M * 3 * d_model * 4               # f32 qkv projection output
    acts = 6 * M * d_model * 4              # x / xn / q / k / v / ctx temps
    io = 2 * 2 * M * d_model * 4            # double-buffered x-in and out
    weights = 2 * 2 * (3 * d_model * d_model + d_model * d_model)  # bf16 x2buf
    return scores + probs + mask + qkv + acts + io + weights


def _pick_batch_block(B, L, n_heads, d_model, vmem_budget_bytes, target_m=256):
    """Batch elements per grid step.

    Packing extra rows only pays while M = bb*L is below the MXU tile width,
    so cap M at target_m; keep >= 2 grid steps so v7x's two TensorCores both
    get work via the 'parallel' grid axis; stay inside the VMEM budget.
    """
    best = 1
    for bb in range(2, B + 1):
        if B % bb:
            continue
        if bb * L > target_m:
            continue
        if B // bb < 2:
            continue
        if _step_vmem_bytes(bb, L, n_heads, d_model) > vmem_budget_bytes:
            continue
        best = bb
    return best


def mha_se3_forward(x, seq_id, params, n_heads, target_m=256):
    """Pallas implementation of MultiHeadAttentionSE3.forward(x, seq_id)."""
    B, L, D = x.shape
    dh = D // n_heads

    try:
        vmem_cap = int(pltpu.get_tpu_info().vmem_capacity_bytes)
    except Exception:
        vmem_cap = 64 * 1024 * 1024          # conservative (v7x physical VMEM)
    vmem_budget = int(vmem_cap * 0.55)
    vmem_limit = max(32 * 1024 * 1024,
                     min(int(vmem_cap * 0.85), 110 * 1024 * 1024))

    bb = _pick_batch_block(B, L, n_heads, D, vmem_budget, target_m)
    G = B // bb
    M = bb * L

    # Per-(batch-row, segment) keys: a flat (M, M) mask inside one batch block
    # then also forbids cross-row attention (bb is tiny; no int32 overflow for
    # realistic seq_id values).
    keys = (seq_id.astype(jnp.int32) * bb
            + (jnp.arange(B, dtype=jnp.int32) % bb)[:, None])
    seg_row = keys.reshape(G, 1, M)
    seg_col = keys.reshape(G, M, 1)

    # Fold the attention scale into the q_ln gamma; pre-cast matmul weights to
    # bf16 so none of this work is redone inside the grid.
    scale = 1.0 / math.sqrt(dh)
    qln_w = (params["qln_w"] * scale).astype(jnp.float32)
    wqkv = params["wqkv_t"].astype(jnp.bfloat16)              # (D, 3D)
    wout = params["wout_t"].astype(jnp.bfloat16)              # (D, D)

    kernel = _make_kernel(n_heads, dh)

    def _const_spec(shape):
        n = len(shape)
        return pl.BlockSpec(shape, lambda b, _n=n: (0,) * _n)

    flops = G * (2 * M * D * 3 * D                   # qkv projection
                 + 2 * n_heads * M * M * dh          # q k^T
                 + 2 * n_heads * M * M * (dh + 1)    # p v (+ denominator col)
                 + 2 * M * D * D)                    # out_proj
    bytes_accessed = (x.size * 4 + B * L * D * 4 + 2 * keys.size * 4
                      + wqkv.size * 2 + wout.size * 2
                      + 4 * (params["ln_w"].size + params["ln_b"].size
                             + params["qln_w"].size + params["kln_w"].size))
    cost = pl.CostEstimate(flops=flops,
                           transcendentals=G * n_heads * M * M,
                           bytes_accessed=bytes_accessed)

    return pl.pallas_call(
        kernel,
        out_shape=jax.ShapeDtypeStruct((B, L, D), jnp.float32),
        grid=(G,),
        in_specs=[
            pl.BlockSpec((bb, L, D), lambda b: (b, 0, 0)),    # x
            pl.BlockSpec((1, 1, M), lambda b: (b, 0, 0)),     # seg keys (row)
            pl.BlockSpec((1, M, 1), lambda b: (b, 0, 0)),     # seg keys (col)
            _const_spec((1, D)),              # layernorm_qkv LN weight
            _const_spec((1, D)),              # layernorm_qkv LN bias
            _const_spec((D, 3 * D)),          # Wqkv (pre-transposed, bf16)
            _const_spec((1, D)),              # q_ln weight (pre-scaled)
            _const_spec((1, D)),              # k_ln weight
            _const_spec((D, D)),              # out_proj W (pre-transposed)
        ],
        out_specs=pl.BlockSpec((bb, L, D), lambda b: (b, 0, 0)),
        compiler_params=pltpu.CompilerParams(
            dimension_semantics=("parallel",),
            vmem_limit_bytes=vmem_limit),
        cost_estimate=cost,
    )(x, seg_row, seg_col, params["ln_w"], params["ln_b"], wqkv, qln_w,
      params["kln_w"], wout)


def ref_forward(x, seq_id, params, n_heads):
    """Pure-JAX f32 reference mirroring the PyTorch forward."""
    B, L, D = x.shape
    dh = D // n_heads
    hp = lax.Precision.HIGHEST
    xn = _layer_norm_ref(x, params["ln_w"][0], params["ln_b"][0])
    qkv = jnp.einsum('bld,de->ble', xn, params["wqkv_t"], precision=hp)
    q, k, v = jnp.split(qkv, 3, axis=-1)
    q = _layer_norm_ref(q, params["qln_w"][0])
    k = _layer_norm_ref(k, params["kln_w"][0])

    def split_heads(t):
        return t.reshape(B, L, n_heads, dh).transpose(0, 2, 1, 3)

    qh, kh, vh = map(split_heads, (q, k, v))
    mask = (seq_id[:, :, None] == seq_id[:, None, :])[:, None, :, :]
    s = jnp.einsum('bhld,bhmd->bhlm', qh, kh, precision=hp) / math.sqrt(dh)
    s = jnp.where(mask, s, -jnp.inf)
    p = jax.nn.softmax(s, axis=-1)
    ctx = jnp.einsum('bhlm,bhmd->bhld', p, vh, precision=hp)
    ctx = ctx.transpose(0, 2, 1, 3).reshape(B, L, D)
    return jnp.einsum('bld,de->ble', ctx, params["wout_t"], precision=hp)


if __name__ == "__main__":
    B, L, D, H = 2, 16, 128, 4

    key = jax.random.PRNGKey(0)
    keys = jax.random.split(key, 7)
    x = jax.random.normal(keys[0], (B, L, D), jnp.float32)
    # two segments per sequence (same-segment attention only)
    seq_id = jnp.concatenate(
        [jnp.zeros((B, L // 2), jnp.int32),
         jnp.ones((B, L - L // 2), jnp.int32)], axis=-1)

    params = {
        "ln_w": 1.0 + 0.1 * jax.random.normal(keys[1], (1, D), jnp.float32),
        "ln_b": 0.1 * jax.random.normal(keys[2], (1, D), jnp.float32),
        "wqkv_t": jax.random.normal(keys[3], (D, 3 * D), jnp.float32) / math.sqrt(D),
        "qln_w": 1.0 + 0.1 * jax.random.normal(keys[4], (1, D), jnp.float32),
        "kln_w": 1.0 + 0.1 * jax.random.normal(keys[5], (1, D), jnp.float32),
        "wout_t": jax.random.normal(keys[6], (D, D), jnp.float32) / math.sqrt(D),
    }

    out = jax.block_until_ready(mha_se3_forward(x, seq_id, params, H))
    ref = ref_forward(x, seq_id, params, H)

    err_max = float(jnp.max(jnp.abs(out - ref)))
    err_rel = float(jnp.linalg.norm(out - ref) / jnp.linalg.norm(ref))
    assert out.shape == (B, L, D)
    # bf16 MXU operands (f32 accumulation) + bf16 exp + approx reciprocal ->
    # loosened tolerance versus the pure-f32 reference.
    assert err_max < 2e-1 and err_rel < 6e-2, \
        f"max abs err {err_max}, rel l2 err {err_rel}"
    print("KERNEL_OK")
</pallas_src>

<mosaic_0001>
module attributes {stable_mosaic.version = 11 : i64} {
  func.func @kernel(%arg0: i32, %arg1: memref<1x16x128xf32, #tpu.memory_space<vmem>>, %arg2: memref<1x1x16xi32, #tpu.memory_space<vmem>>, %arg3: memref<1x16x1xi32, #tpu.memory_space<vmem>>, %arg4: memref<1x128xf32, #tpu.memory_space<vmem>>, %arg5: memref<1x128xf32, #tpu.memory_space<vmem>>, %arg6: memref<128x384xbf16, #tpu.memory_space<vmem>>, %arg7: memref<1x128xf32, #tpu.memory_space<vmem>>, %arg8: memref<1x128xf32, #tpu.memory_space<vmem>>, %arg9: memref<128x128xbf16, #tpu.memory_space<vmem>>, %arg10: memref<1x16x128xf32, #tpu.memory_space<vmem>>) attributes {dimension_semantics = [#tpu.dimension_semantics<parallel>], iteration_bounds = array<i64: 2>, scalar_prefetch = 0 : i64, scratch_operands = 0 : i64, tpu.core_type = #tpu.core_type<tc>, window_params = [{transform_indices = @transform_0, window_bounds = array<i64: 1, 16, 128>}, {transform_indices = @transform_1, window_bounds = array<i64: 1, 1, 16>}, {transform_indices = @transform_2, window_bounds = array<i64: 1, 16, 1>}, {pipeline_mode = #tpu.pipeline_mode<synchronous>, transform_indices = @transform_3, window_bounds = array<i64: 1, 128>}, {pipeline_mode = #tpu.pipeline_mode<synchronous>, transform_indices = @transform_4, window_bounds = array<i64: 1, 128>}, {pipeline_mode = #tpu.pipeline_mode<synchronous>, transform_indices = @transform_5, window_bounds = array<i64: 128, 384>}, {pipeline_mode = #tpu.pipeline_mode<synchronous>, transform_indices = @transform_6, window_bounds = array<i64: 1, 128>}, {pipeline_mode = #tpu.pipeline_mode<synchronous>, transform_indices = @transform_7, window_bounds = array<i64: 1, 128>}, {pipeline_mode = #tpu.pipeline_mode<synchronous>, transform_indices = @transform_8, window_bounds = array<i64: 128, 128>}, {transform_indices = @transform_9, window_bounds = array<i64: 1, 16, 128>}]} {
    %c0 = arith.constant 0 : index
    %c0_0 = arith.constant 0 : index
    %c0_1 = arith.constant 0 : index
    %0 = vector.load %arg1[%c0, %c0_0, %c0_1] : memref<1x16x128xf32, #tpu.memory_space<vmem>>, vector<1x16x128xf32>
    %1 = vector.shape_cast %0 : vector<1x16x128xf32> to vector<16x128xf32>
    %c0_2 = arith.constant 0 : index
    %c0_3 = arith.constant 0 : index
    %2 = vector.load %arg4[%c0_2, %c0_3] : memref<1x128xf32, #tpu.memory_space<vmem>>, vector<1x128xf32>
    %3 = vector.shape_cast %2 : vector<1x128xf32> to vector<128xf32>
    %c0_4 = arith.constant 0 : index
    %c0_5 = arith.constant 0 : index
    %4 = vector.load %arg5[%c0_4, %c0_5] : memref<1x128xf32, #tpu.memory_space<vmem>>, vector<1x128xf32>
    %5 = vector.shape_cast %4 : vector<1x128xf32> to vector<128xf32>
    %cst = arith.constant dense<0.000000e+00> : vector<16xf32>
    %6 = vector.multi_reduction <add>, %1, %cst [1] : vector<16x128xf32> to vector<16xf32>
    %7 = vector.shape_cast %6 : vector<16xf32> to vector<16x1xf32>
    %cst_6 = arith.constant 1.280000e+02 : f32
    %8 = vector.broadcast %cst_6 : f32 to vector<16x1xf32>
    %9 = arith.divf %7, %8 : vector<16x1xf32>
    %10 = arith.mulf %1, %1 : vector<16x128xf32>
    %cst_7 = arith.constant dense<0.000000e+00> : vector<16xf32>
    %11 = vector.multi_reduction <add>, %10, %cst_7 [1] : vector<16x128xf32> to vector<16xf32>
    %12 = vector.shape_cast %11 : vector<16xf32> to vector<16x1xf32>
    %cst_8 = arith.constant 1.280000e+02 : f32
    %13 = vector.broadcast %cst_8 : f32 to vector<16x1xf32>
    %14 = arith.divf %12, %13 : vector<16x1xf32>
    %15 = arith.mulf %9, %9 : vector<16x1xf32>
    %16 = arith.subf %14, %15 : vector<16x1xf32>
    %cst_9 = arith.constant 0.000000e+00 : f32
    %17 = vector.broadcast %cst_9 : f32 to vector<16x1xf32>
    %18 = arith.maximumf %16, %17 : vector<16x1xf32>
    %19 = vector.broadcast %9 : vector<16x1xf32> to vector<16x128xf32>
    %20 = arith.subf %1, %19 : vector<16x128xf32>
    %cst_10 = arith.constant 9.99999974E-6 : f32
    %21 = vector.broadcast %cst_10 : f32 to vector<16x1xf32>
    %22 = arith.addf %18, %21 : vector<16x1xf32>
    %23 = math.rsqrt %22 : vector<16x1xf32>
    %24 = vector.broadcast %23 : vector<16x1xf32> to vector<16x128xf32>
    %25 = arith.mulf %20, %24 : vector<16x128xf32>
    %26 = vector.shape_cast %3 : vector<128xf32> to vector<1x128xf32>
    %27 = vector.broadcast %26 : vector<1x128xf32> to vector<16x128xf32>
    %28 = arith.mulf %25, %27 : vector<16x128xf32>
    %29 = vector.shape_cast %5 : vector<128xf32> to vector<1x128xf32>
    %30 = vector.broadcast %29 : vector<1x128xf32> to vector<16x128xf32>
    %31 = arith.addf %28, %30 : vector<16x128xf32>
    %32 = arith.truncf %31 : vector<16x128xf32> to vector<16x128xbf16>
    %c0_11 = arith.constant 0 : index
    %c0_12 = arith.constant 0 : index
    %33 = vector.load %arg6[%c0_11, %c0_12] : memref<128x384xbf16, #tpu.memory_space<vmem>>, vector<128x384xbf16>
    %cst_13 = arith.constant dense<0.000000e+00> : vector<16x384xf32>
    %34 = tpu.matmul %32, %33, %cst_13 {dimension_numbers = #tpu.dot_dimension_numbers<[1], [0], [0], [1], [0, 0, 1, 1], [], []>} : vector<16x128xbf16>, vector<128x384xbf16>, vector<16x384xf32> -> vector<16x384xf32>
    %35 = vector.extract_strided_slice %34 {offsets = [0, 0], sizes = [16, 128], strides = [1, 1]} : vector<16x384xf32> to vector<16x128xf32>
    %36 = vector.extract_strided_slice %34 {offsets = [0, 128], sizes = [16, 128], strides = [1, 1]} : vector<16x384xf32> to vector<16x128xf32>
    %37 = vector.extract_strided_slice %34 {offsets = [0, 256], sizes = [16, 128], strides = [1, 1]} : vector<16x384xf32> to vector<16x128xf32>
    %c0_14 = arith.constant 0 : index
    %c0_15 = arith.constant 0 : index
    %38 = vector.load %arg7[%c0_14, %c0_15] : memref<1x128xf32, #tpu.memory_space<vmem>>, vector<1x128xf32>
    %39 = vector.shape_cast %38 : vector<1x128xf32> to vector<128xf32>
    %cst_16 = arith.constant dense<0.000000e+00> : vector<16xf32>
    %40 = vector.multi_reduction <add>, %35, %cst_16 [1] : vector<16x128xf32> to vector<16xf32>
    %41 = vector.shape_cast %40 : vector<16xf32> to vector<16x1xf32>
    %cst_17 = arith.constant 1.280000e+02 : f32
    %42 = vector.broadcast %cst_17 : f32 to vector<16x1xf32>
    %43 = arith.divf %41, %42 : vector<16x1xf32>
    %44 = arith.mulf %35, %35 : vector<16x128xf32>
    %cst_18 = arith.constant dense<0.000000e+00> : vector<16xf32>
    %45 = vector.multi_reduction <add>, %44, %cst_18 [1] : vector<16x128xf32> to vector<16xf32>
    %46 = vector.shape_cast %45 : vector<16xf32> to vector<16x1xf32>
    %cst_19 = arith.constant 1.280000e+02 : f32
    %47 = vector.broadcast %cst_19 : f32 to vector<16x1xf32>
    %48 = arith.divf %46, %47 : vector<16x1xf32>
    %49 = arith.mulf %43, %43 : vector<16x1xf32>
    %50 = arith.subf %48, %49 : vector<16x1xf32>
    %cst_20 = arith.constant 0.000000e+00 : f32
    %51 = vector.broadcast %cst_20 : f32 to vector<16x1xf32>
    %52 = arith.maximumf %50, %51 : vector<16x1xf32>
    %53 = vector.broadcast %43 : vector<16x1xf32> to vector<16x128xf32>
    %54 = arith.subf %35, %53 : vector<16x128xf32>
    %cst_21 = arith.constant 9.99999974E-6 : f32
    %55 = vector.broadcast %cst_21 : f32 to vector<16x1xf32>
    %56 = arith.addf %52, %55 : vector<16x1xf32>
    %57 = math.rsqrt %56 : vector<16x1xf32>
    %58 = vector.broadcast %57 : vector<16x1xf32> to vector<16x128xf32>
    %59 = arith.mulf %54, %58 : vector<16x128xf32>
    %60 = vector.shape_cast %39 : vector<128xf32> to vector<1x128xf32>
    %61 = vector.broadcast %60 : vector<1x128xf32> to vector<16x128xf32>
    %62 = arith.mulf %59, %61 : vector<16x128xf32>
    %63 = arith.truncf %62 : vector<16x128xf32> to vector<16x128xbf16>
    %c0_22 = arith.constant 0 : index
    %c0_23 = arith.constant 0 : index
    %64 = vector.load %arg8[%c0_22, %c0_23] : memref<1x128xf32, #tpu.memory_space<vmem>>, vector<1x128xf32>
    %65 = vector.shape_cast %64 : vector<1x128xf32> to vector<128xf32>
    %cst_24 = arith.constant dense<0.000000e+00> : vector<16xf32>
    %66 = vector.multi_reduction <add>, %36, %cst_24 [1] : vector<16x128xf32> to vector<16xf32>
    %67 = vector.shape_cast %66 : vector<16xf32> to vector<16x1xf32>
    %cst_25 = arith.constant 1.280000e+02 : f32
    %68 = vector.broadcast %cst_25 : f32 to vector<16x1xf32>
    %69 = arith.divf %67, %68 : vector<16x1xf32>
    %70 = arith.mulf %36, %36 : vector<16x128xf32>
    %cst_26 = arith.constant dense<0.000000e+00> : vector<16xf32>
    %71 = vector.multi_reduction <add>, %70, %cst_26 [1] : vector<16x128xf32> to vector<16xf32>
    %72 = vector.shape_cast %71 : vector<16xf32> to vector<16x1xf32>
    %cst_27 = arith.constant 1.280000e+02 : f32
    %73 = vector.broadcast %cst_27 : f32 to vector<16x1xf32>
    %74 = arith.divf %72, %73 : vector<16x1xf32>
    %75 = arith.mulf %69, %69 : vector<16x1xf32>
    %76 = arith.subf %74, %75 : vector<16x1xf32>
    %cst_28 = arith.constant 0.000000e+00 : f32
    %77 = vector.broadcast %cst_28 : f32 to vector<16x1xf32>
    %78 = arith.maximumf %76, %77 : vector<16x1xf32>
    %79 = vector.broadcast %69 : vector<16x1xf32> to vector<16x128xf32>
    %80 = arith.subf %36, %79 : vector<16x128xf32>
    %cst_29 = arith.constant 9.99999974E-6 : f32
    %81 = vector.broadcast %cst_29 : f32 to vector<16x1xf32>
    %82 = arith.addf %78, %81 : vector<16x1xf32>
    %83 = math.rsqrt %82 : vector<16x1xf32>
    %84 = vector.broadcast %83 : vector<16x1xf32> to vector<16x128xf32>
    %85 = arith.mulf %80, %84 : vector<16x128xf32>
    %86 = vector.shape_cast %65 : vector<128xf32> to vector<1x128xf32>
    %87 = vector.broadcast %86 : vector<1x128xf32> to vector<16x128xf32>
    %88 = arith.mulf %85, %87 : vector<16x128xf32>
    %89 = arith.truncf %88 : vector<16x128xf32> to vector<16x128xbf16>
    %90 = arith.truncf %37 : vector<16x128xf32> to vector<16x128xbf16>
    %91 = vector.shape_cast %63 : vector<16x128xbf16> to vector<16x4x32xbf16>
    %92 = tpu.transpose %91, [1, 0, 2] : vector<16x4x32xbf16> -> vector<4x16x32xbf16>
    %93 = vector.shape_cast %89 : vector<16x128xbf16> to vector<16x4x32xbf16>
    %94 = tpu.transpose %93, [1, 0, 2] : vector<16x4x32xbf16> -> vector<4x16x32xbf16>
    %95 = vector.shape_cast %90 : vector<16x128xbf16> to vector<16x4x32xbf16>
    %96 = tpu.transpose %95, [1, 0, 2] : vector<16x4x32xbf16> -> vector<4x16x32xbf16>
    %cst_30 = arith.constant dense<0.000000e+00> : vector<4x16x16xf32>
    %97 = tpu.matmul %92, %94, %cst_30 {dimension_numbers = #tpu.dot_dimension_numbers<[2], [2], [1], [1], [0, 0, 0, 1, 1, 1], [0], [0]>} : vector<4x16x32xbf16>, vector<4x16x32xbf16>, vector<4x16x16xf32> -> vector<4x16x16xf32>
    %c0_31 = arith.constant 0 : index
    %c0_32 = arith.constant 0 : index
    %c0_33 = arith.constant 0 : index
    %98 = vector.load %arg3[%c0_31, %c0_32, %c0_33] : memref<1x16x1xi32, #tpu.memory_space<vmem>>, vector<1x16x1xi32>
    %99 = vector.shape_cast %98 : vector<1x16x1xi32> to vector<16x1xi32>
    %c0_34 = arith.constant 0 : index
    %c0_35 = arith.constant 0 : index
    %c0_36 = arith.constant 0 : index
    %100 = vector.load %arg2[%c0_34, %c0_35, %c0_36] : memref<1x1x16xi32, #tpu.memory_space<vmem>>, vector<1x1x16xi32>
    %101 = vector.shape_cast %100 : vector<1x1x16xi32> to vector<1x16xi32>
    %102 = vector.broadcast %99 : vector<16x1xi32> to vector<16x16xi32>
    %103 = vector.broadcast %101 : vector<1x16xi32> to vector<16x16xi32>
    %104 = arith.cmpi eq, %102, %103 : vector<16x16xi32>
    %cst_37 = arith.constant 0.000000e+00 : f32
    %cst_38 = arith.constant -1.000000e+30 : f32
    %105 = vector.broadcast %cst_37 : f32 to vector<16x16xf32>
    %106 = vector.broadcast %cst_38 : f32 to vector<16x16xf32>
    %107 = arith.select %104, %105, %106 : vector<16x16xi1>, vector<16x16xf32>
    %108 = vector.shape_cast %107 : vector<16x16xf32> to vector<1x16x16xf32>
    %109 = vector.broadcast %108 : vector<1x16x16xf32> to vector<4x16x16xf32>
    %110 = arith.addf %97, %109 : vector<4x16x16xf32>
    %cst_39 = arith.constant dense<0xFF800000> : vector<4x16xf32>
    %111 = vector.multi_reduction <maximumf>, %110, %cst_39 [2] : vector<4x16x16xf32> to vector<4x16xf32>
    %112 = vector.shape_cast %111 : vector<4x16xf32> to vector<4x16x1xf32>
    %113 = vector.broadcast %112 : vector<4x16x1xf32> to vector<4x16x16xf32>
    %114 = arith.subf %110, %113 : vector<4x16x16xf32>
    %115 = arith.truncf %114 : vector<4x16x16xf32> to vector<4x16x16xbf16>
    %116 = math.exp %115 : vector<4x16x16xbf16>
    %cst_40 = arith.constant 1.000000e+00 : bf16
    %117 = vector.broadcast %cst_40 : bf16 to vector<4x16x1xbf16>
    %118 = tpu.concatenate %96, %117 in 2 : vector<4x16x32xbf16>, vector<4x16x1xbf16> -> vector<4x16x33xbf16>
    %cst_41 = arith.constant dense<0.000000e+00> : vector<4x16x33xf32>
    %119 = tpu.matmul %116, %118, %cst_41 {dimension_numbers = #tpu.dot_dimension_numbers<[2], [1], [1], [2], [0, 0, 0, 1, 1, 2], [0], [0]>} : vector<4x16x16xbf16>, vector<4x16x33xbf16>, vector<4x16x33xf32> -> vector<4x16x33xf32>
    %120 = vector.extract_strided_slice %119 {offsets = [0, 0, 0], sizes = [4, 16, 32], strides = [1, 1, 1]} : vector<4x16x33xf32> to vector<4x16x32xf32>
    %121 = vector.extract_strided_slice %119 {offsets = [0, 0, 32], sizes = [4, 16, 1], strides = [1, 1, 1]} : vector<4x16x33xf32> to vector<4x16x1xf32>
    %122 = tpu.reciprocal %121 {approx = true} : vector<4x16x1xf32> -> vector<4x16x1xf32>
    %123 = vector.broadcast %122 : vector<4x16x1xf32> to vector<4x16x32xf32>
    %124 = arith.mulf %120, %123 : vector<4x16x32xf32>
    %125 = arith.truncf %124 : vector<4x16x32xf32> to vector<4x16x32xbf16>
    %126 = tpu.transpose %125, [1, 0, 2] : vector<4x16x32xbf16> -> vector<16x4x32xbf16>
    %127 = vector.shape_cast %126 : vector<16x4x32xbf16> to vector<16x128xbf16>
    %c0_42 = arith.constant 0 : index
    %c0_43 = arith.constant 0 : index
    %128 = vector.load %arg9[%c0_42, %c0_43] : memref<128x128xbf16, #tpu.memory_space<vmem>>, vector<128x128xbf16>
    %cst_44 = arith.constant dense<0.000000e+00> : vector<16x128xf32>
    %129 = tpu.matmul %127, %128, %cst_44 {dimension_numbers = #tpu.dot_dimension_numbers<[1], [0], [0], [1], [0, 0, 1, 1], [], []>} : vector<16x128xbf16>, vector<128x128xbf16>, vector<16x128xf32> -> vector<16x128xf32>
    %130 = vector.shape_cast %129 : vector<16x128xf32> to vector<1x16x128xf32>
    %c0_45 = arith.constant 0 : index
    %c0_46 = arith.constant 0 : index
    %c0_47 = arith.constant 0 : index
    %131 = vector.load %arg10[%c0_45, %c0_46, %c0_47] : memref<1x16x128xf32, #tpu.memory_space<vmem>>, vector<1x16x128xf32>
    tpu.vector_store %arg10[%c0_45, %c0_46, %c0_47], %130 {strides = array<i32>} : memref<1x16x128xf32, #tpu.memory_space<vmem>>, vector<1x16x128xf32>,
    return
  }
  func.func @transform_0(%arg0: i32) -> (i32, i32, i32) {
    %c0_i32 = arith.constant 0 : i32
    %c0_i32_0 = arith.constant 0 : i32
    %c0_i32_1 = arith.constant 0 : i32
    return %arg0, %c0_i32, %c0_i32_0 : i32, i32, i32
  }
  func.func @transform_1(%arg0: i32) -> (i32, i32, i32) {
    %c0_i32 = arith.constant 0 : i32
    %c0_i32_0 = arith.constant 0 : i32
    %c0_i32_1 = arith.constant 0 : i32
    return %arg0, %c0_i32, %c0_i32_0 : i32, i32, i32
  }
  func.func @transform_2(%arg0: i32) -> (i32, i32, i32) {
    %c0_i32 = arith.constant 0 : i32
    %c0_i32_0 = arith.constant 0 : i32
    %c0_i32_1 = arith.constant 0 : i32
    return %arg0, %c0_i32, %c0_i32_0 : i32, i32, i32
  }
  func.func @transform_3(%arg0: i32) -> (i32, i32) {
    %c0_i32 = arith.constant 0 : i32
    %c0_i32_0 = arith.constant 0 : i32
    %c0_i32_1 = arith.constant 0 : i32
    return %c0_i32, %c0_i32_0 : i32, i32
  }
  func.func @transform_4(%arg0: i32) -> (i32, i32) {
    %c0_i32 = arith.constant 0 : i32
    %c0_i32_0 = arith.constant 0 : i32
    %c0_i32_1 = arith.constant 0 : i32
    return %c0_i32, %c0_i32_0 : i32, i32
  }
  func.func @transform_5(%arg0: i32) -> (i32, i32) {
    %c0_i32 = arith.constant 0 : i32
    %c0_i32_0 = arith.constant 0 : i32
    %c0_i32_1 = arith.constant 0 : i32
    return %c0_i32, %c0_i32_0 : i32, i32
  }
  func.func @transform_6(%arg0: i32) -> (i32, i32) {
    %c0_i32 = arith.constant 0 : i32
    %c0_i32_0 = arith.constant 0 : i32
    %c0_i32_1 = arith.constant 0 : i32
    return %c0_i32, %c0_i32_0 : i32, i32
  }
  func.func @transform_7(%arg0: i32) -> (i32, i32) {
    %c0_i32 = arith.constant 0 : i32
    %c0_i32_0 = arith.constant 0 : i32
    %c0_i32_1 = arith.constant 0 : i32
    return %c0_i32, %c0_i32_0 : i32, i32
  }
  func.func @transform_8(%arg0: i32) -> (i32, i32) {
    %c0_i32 = arith.constant 0 : i32
    %c0_i32_0 = arith.constant 0 : i32
    %c0_i32_1 = arith.constant 0 : i32
    return %c0_i32, %c0_i32_0 : i32, i32
  }
  func.func @transform_9(%arg0: i32) -> (i32, i32, i32) {
    %c0_i32 = arith.constant 0 : i32
    %c0_i32_0 = arith.constant 0 : i32
    %c0_i32_1 = arith.constant 0 : i32
    return %arg0, %c0_i32, %c0_i32_0 : i32, i32, i32
  }
}

</mosaic_0001>

<bundles_post_ra>
// kernel: tpu_custom_call.1
= control target key start
LH: loop header
LB: loop body
LE: loop exit
PB: predicated region body
PF: predicated region fallthrough
CT: control target
= control target key end

     0   :  { %s4158_s0 = inlined_call_operand.hbm [shape: f32[2,16,128], index: 0, kind: input, shape index: {}]   ;;  %s4159_s1 = inlined_call_operand.hbm [shape: s32[2,1,16], index: 1, kind: input, shape index: {}]   ;;  %s4160_s2 = inlined_call_operand.vmem [shape: s32[2,16,1], index: 2, kind: input, shape index: {}]   ;;  %s4161_s3 = inlined_call_operand.hbm [shape: f32[1,128], index: 3, kind: input, shape index: {}]   ;;  %s4162_s4 = inlined_call_operand.hbm [shape: f32[1,128], index: 4, kind: input, shape index: {}]   ;;  %s4163_s5 = inlined_call_operand.hbm [shape: bf16[128,384], index: 5, kind: input, shape index: {}]   ;;  %s4164_s6 = inlined_call_operand.hbm [shape: f32[1,128], index: 6, kind: input, shape index: {}]   ;;  %s4165_s7 = inlined_call_operand.hbm [shape: f32[1,128], index: 7, kind: input, shape index: {}]   ;;  %s4166_s8 = inlined_call_operand.vmem [shape: bf16[128,128], index: 8, kind: input, shape index: {}]   ;;  %s4167_s9 = inlined_call_operand.hbm [shape: f32[2,16,128], index: 9, kind: output, shape index: {}]  }
   0x1   :  { %4172 = sst [smem:[#allocation21_spill]] %s4158_s0 }
   0x2   :  { %4173 = sst [smem:[#allocation22_spill]] %s4161_s3 }
   0x3   :  { %4174 = sst [smem:[#allocation23_spill]] %s4162_s4 }
   0x4   :  { %4175 = sst [smem:[#allocation24_spill]] %s4163_s5 }
   0x5   :  { %4176 = sst [smem:[#allocation25_spill]] %s4164_s6 }
   0x6   :  { %4177 = sst [smem:[#allocation26_spill]] %s4165_s7 }
   0x7   :  { %14 = vsyncpa [#allocation3], 0 }
   0x8   :  { %16 = vsyncpa [#allocation3 + $0x1], 0 }
   0x9   :  { %17 = vsyncpa [#allocation6], 0 }
   0xa   :  { %19 = vsyncpa [#allocation6 + $0x1], 0 }
   0xb   :  { %20 = vsyncpa [#allocation9], 0 }
   0xc   :  { %21 = vsyncpa [#allocation12], 0 }
   0xd   :  { %22 = vsyncpa [#allocation4], 0 }
   0xe   :  { %24 = vsyncpa [#allocation4 + $0x1], 0  ;;  %s3471_s30 = smov 0   ;;  %s3473_s10 = smov 0  }
   0xf   :  { %s3475_s11 = smov 0   ;;  %s3477_s12 = smov 0  }
  0x10 LB: > { %s3397_s13 = smov [#allocation7]   ;;  %s3492_s15 = sadd.s32 4294967295, %s3395_s12   ;;  %s3395_s12 = sphi %s3477_s12, %s4207_s12   ;;  %s3391_s11 = sphi %s3475_s11, %s4206_s11   ;;  %s3387_s10 = sphi %s3473_s10, %s4205_s10   ;;  %s3383_s30 = sphi %s3471_s30, %s4204_s30  }
  0x11   : > { %s278_s14 = sshll.u32 %s3397_s13, 4  ;;  %p2703_p0 = scmp.ge.s32.totalorder %s3395_s12, 1  ;;  %s3497_s14 = int_to_ptr.vmem [resolvable:$true] %s278_s14 }
  0x12   : > { %p4168_p1 = scmp.eq.s32.totalorder %s3492_s15, 0  ;;  %p265_p2 = scmp.lt.s32.totalorder %s3395_s12, 3 }
  0x13   : > { %s3398_s17 = smov [#allocation8]   ;;  %s3399_s19 = smov [#allocation11]  }
  0x14   : > { %p3499_p3 = pnand %p2703_p0, %p265_p2  ;;  %s289_s18 = sshll.u32 %s3398_s17, 4  ;;  %s3506_s18 = int_to_ptr.vmem [resolvable:$true] %s289_s18 }
  0x15   : > { %s313_s20 = sshll.u32 %s3399_s19, 4  ;;  %s3400_s22 = smov [#allocation10]   ;;  %s3514_s20 = int_to_ptr.vmem [resolvable:$true] %s313_s20 }
  0x16   : > { %s4178_s16 = scalar_select %p3499_p3, 1, 0 }
  0x17   : > { %p2941_p5 = pneg %p3499_p3  ;;  %s3516_s23 = sshll.u32 %s3400_s22, 4  ;;  %s300_s23 = int_to_ptr.vmem [resolvable:$true] %s3516_s23 }
  0x18   : > { %s4180_s3 = sld [smem:[#allocation22_spill]] }
  0x19   : > { %p3510_p6 = pnand %p2941_p5, %p4168_p1 }
  0x1b   : > { %p3526_p8 = pneg %p3510_p6 }
  0x1e   : > { %s3113_s26 = scalar_lea.hbm %s4180_s3, 16 }
  0x1f   : > { %p3114_p7 = scmp.ne.s32.totalorder %s4180_s3, %s3113_s26  ;;  %p3120_p11 = scmp.lt.u32.totalorder %s3113_s26, %s4180_s3 }
  0x21   : > { %p3116_p9 = pnand %p3526_p8, %p3114_p7 }
  0x23   : > { %p3117_p10 = pneg %p3116_p9 }
  0x25   : > { %p3122_p12 = pnand %p3120_p11, %p3117_p10 }
  0x27   : > { %3125 = shalt.err (!%p3122_p12)
}
  0x28   : > { %s3126_s19 = scalar_lea.vmem %s3497_s14, 16  ;;  %s3133_s22 = scalar_lea.vmem %s3497_s14, 32 }
  0x29   : > { %p3127_p13 = scmp.ne.s32.totalorder %s3497_s14, %s3126_s19  ;;  %p3134_p5 = scmp.lt.s32.totalorder %s3497_s14, %s3497_s14 }
  0x2a   : > { %p3135_p7 = scmp.lt.s32.totalorder %s3133_s22, %s3126_s19 }
  0x2b   : > { %p3129_p0 = pnand %p3127_p13, %p3526_p8 }
  0x2c   : > { %p3136_p9 = por %p3135_p7, %p3134_p5 }
  0x2d   : > { %p3130_p2 = pneg %p3129_p0 }
  0x2f   : > { %p3137_p4 = pnand %p3136_p9, %p3130_p2 }
  0x31   : > { %3140 = shalt.err (!%p3137_p4)
}
  0x32   : > { %2944 = dma.hbm_to_vmem [thread:$0]  (!%p3510_p6), %s4180_s3, 16, %s3497_s14, [#allocation6]  }
  0x33   : > { %s4182_s4 = sld [smem:[#allocation23_spill]] }
  0x39   : > { %s3141_s28 = scalar_lea.hbm %s4182_s4, 16 }
  0x3a   : > { %p3142_p10 = scmp.ne.s32.totalorder %s4182_s4, %s3141_s28  ;;  %p3148_p4 = scmp.lt.u32.totalorder %s3141_s28, %s4182_s4 }
  0x3c   : > { %p3144_p11 = pnand %p3142_p10, %p3526_p8 }
  0x3e   : > { %p3145_p12 = pneg %p3144_p11 }
  0x40   : > { %p3150_p13 = pnand %p3148_p4, %p3145_p12 }
  0x42   : > { %3153 = shalt.err (!%p3150_p13)
}
  0x43   : > { %s3154_s14 = scalar_lea.vmem %s3506_s18, 16  ;;  %s3161_s24 = scalar_lea.vmem %s3506_s18, 32 }
  0x44   : > { %p3155_p0 = scmp.ne.s32.totalorder %s3506_s18, %s3154_s14  ;;  %p3162_p7 = scmp.lt.s32.totalorder %s3506_s18, %s3506_s18 }
  0x45   : > { %p3163_p9 = scmp.lt.s32.totalorder %s3161_s24, %s3154_s14 }
  0x46   : > { %p3157_p2 = pnand %p3155_p0, %p3526_p8 }
  0x47   : > { %p3164_p10 = por %p3163_p9, %p3162_p7 }
  0x48   : > { %p3158_p5 = pneg %p3157_p2 }
  0x4a   : > { %p3165_p11 = pnand %p3164_p10, %p3158_p5 }
  0x4c   : > { %3168 = shalt.err (!%p3165_p11)
}
  0x4d   : > { %2947 = dma.hbm_to_vmem [thread:$0]  (!%p3510_p6), %s4182_s4, 16, %s3506_s18, [#allocation9]  }
  0x4e   : > { %s4183_s6 = sld [smem:[#allocation25_spill]] }
  0x54   : > { %s3169_s13 = scalar_lea.hbm %s4183_s6, 16 }
  0x55   : > { %p3170_p12 = scmp.ne.s32.totalorder %s4183_s6, %s3169_s13  ;;  %p3176_p0 = scmp.lt.u32.totalorder %s3169_s13, %s4183_s6 }
  0x57   : > { %p3172_p4 = pnand %p3170_p12, %p3526_p8 }
  0x59   : > { %p3173_p13 = pneg %p3172_p4 }
  0x5b   : > { %p3178_p2 = pnand %p3176_p0, %p3173_p13 }
  0x5d   : > { %3181 = shalt.err (!%p3178_p2)
}
  0x5e   : > { %s3182_s18 = scalar_lea.vmem %s3514_s20, 16  ;;  %s3189_s24 = scalar_lea.vmem %s3514_s20, 32 }
  0x5f   : > { %p3183_p5 = scmp.ne.s32.totalorder %s3514_s20, %s3182_s18  ;;  %p3190_p10 = scmp.lt.s32.totalorder %s3514_s20, %s3514_s20 }
  0x60   : > { %p3191_p11 = scmp.lt.s32.totalorder %s3189_s24, %s3182_s18 }
  0x61   : > { %p3185_p7 = pnand %p3183_p5, %p3526_p8 }
  0x62   : > { %p3192_p12 = por %p3191_p11, %p3190_p10 }
  0x63   : > { %p3186_p9 = pneg %p3185_p7 }
  0x65   : > { %p3193_p4 = pnand %p3192_p12, %p3186_p9 }
  0x67   : > { %3196 = shalt.err (!%p3193_p4)
}
  0x68   : > { %2953 = dma.hbm_to_vmem [thread:$0]  (!%p3510_p6), %s4183_s6, 16, %s3514_s20, [#allocation12]  }
  0x69   : > { %s4184_s5 = sld [smem:[#allocation24_spill]] }
  0x6f   : > { %s3197_s13 = scalar_lea.hbm %s4184_s5, 3072 }
  0x70   : > { %p3198_p13 = scmp.ne.s32.totalorder %s4184_s5, %s3197_s13  ;;  %p3204_p5 = scmp.lt.u32.totalorder %s3197_s13, %s4184_s5 }
  0x72   : > { %p3200_p0 = pnand %p3198_p13, %p3526_p8 }
  0x74   : > { %p3201_p2 = pneg %p3200_p0 }
  0x76   : > { %p3206_p7 = pnand %p3204_p5, %p3201_p2 }
  0x78   : > { %3209 = shalt.err (!%p3206_p7)
}
  0x79   : > { %s3210_s18 = scalar_lea.vmem %s300_s23, 3072  ;;  %p3218_p12 = scmp.lt.s32.totalorder %s300_s23, %s300_s23 }
  0x7a   : > { %p3211_p9 = scmp.ne.s32.totalorder %s300_s23, %s3210_s18  ;;  %p3219_p4 = scmp.lt.s32.totalorder %s3210_s18, %s3210_s18 }
  0x7c   : > { %p3213_p10 = pnand %p3211_p9, %p3526_p8  ;;  %p3220_p1 = por %p3219_p4, %p3218_p12 }
  0x7e   : > { %p3214_p11 = pneg %p3213_p10 }
  0x80   : > { %p3221_p3 = pnand %p3220_p1, %p3214_p11 }
  0x82   : > { %3224 = shalt.err (!%p3221_p3)
}
  0x83   : > { %s3401_s20 = smov 192   ;;  %s3402_s24 = smov 12  }
  0x84   : > { %2950 = dma.hbm_to_vmem [thread:$0]  (!%p3510_p6), %s4184_s5, 3072, %s300_s23, [#allocation9], %s3401_s20, %s3401_s20, %s3402_s24  }
  0x85   : > { %s3403_s27 = smov [#allocation13]   ;;  %s4185_s7 = sld [smem:[#allocation26_spill]] }
  0x86   : > { %s324_s28 = sshll.u32 %s3403_s27, 4  ;;  %s325_s28 = int_to_ptr.vmem [resolvable:$true] %s324_s28 }
  0x8b   : > { %s3225_s19 = scalar_lea.hbm %s4185_s7, 16 }
  0x8c   : > { %p3226_p1 = scmp.ne.s32.totalorder %s4185_s7, %s3225_s19  ;;  %p3232_p0 = scmp.lt.u32.totalorder %s3225_s19, %s4185_s7 }
  0x8e   : > { %p3228_p3 = pnand %p3226_p1, %p3526_p8 }
  0x90   : > { %p3229_p13 = pneg %p3228_p3 }
  0x92   : > { %p3234_p2 = pnand %p3232_p0, %p3229_p13 }
  0x94   : > { %3237 = shalt.err (!%p3234_p2)
}
  0x95   : > { %s3238_s23 = scalar_lea.vmem %s325_s28, 16  ;;  %s3245_s20 = scalar_lea.vmem %s325_s28, 32 }
  0x96   : > { %p3239_p5 = scmp.ne.s32.totalorder %s325_s28, %s3238_s23  ;;  %p3246_p10 = scmp.lt.s32.totalorder %s325_s28, %s325_s28 }
  0x97   : > { %p3247_p11 = scmp.lt.s32.totalorder %s3245_s20, %s3238_s23 }
  0x98   : > { %p3241_p7 = pnand %p3239_p5, %p3526_p8 }
  0x99   : > { %p3248_p12 = por %p3247_p11, %p3246_p10 }
  0x9a   : > { %p3242_p9 = pneg %p3241_p7 }
  0x9c   : > { %p3249_p4 = pnand %p3248_p12, %p3242_p9 }
  0x9e   : > { %3252 = shalt.err (!%p3249_p4)
}
  0x9f   : > { %2956 = dma.hbm_to_vmem [thread:$0]  (!%p3510_p6), %s4185_s7, 16, %s325_s28, [#allocation12]  }
  0xa0   : > { %s2702_s3 = sadd.s32 4294967294, %s3395_s12   ;;  %s3635_s21 = sadd.s32 1, %s3395_s12  }
  0xa1   : > { %s37_s29 = sadd.s32 1, %s3391_s11  ;;  %s34_s26 = ssub.s32 %s3395_s12, %s3635_s21 }
  0xa2   : > { %p44_p8 = scmp.ne.s32.totalorder %s3391_s11, %s3387_s10  ;;  %p35_p1 = scmp.eq.s32.totalorder %s34_s26, 0 }
  0xa3   : > { %p45_p3 = scmp.eq.s32.totalorder %s3395_s12, 0  ;;  %p50_p13 = scmp.ne.s32.totalorder %s3387_s10, %s3383_s30 }
  0xa4   : > { %p252_p0 = scmp.eq.s32.totalorder %s3492_s15, 1  ;;  %p4186_p5 = scmp.eq.s32.totalorder %s3492_s15, 0 }
  0xa5   : > { %s3647_s27 = scalar_select %p35_p1, %s3391_s11, %s37_s29  }
  0xa6   : > { %p46_p2 = por %p45_p3, %p44_p8  ;;  %p3651_p7 = por %p4186_p5, %p50_p13 }
  0xa7   : > { %p3655_p6 = por %p252_p0, %p44_p8  ;;  %p258_p9 = scmp.eq.s32.totalorder %s2702_s3, 1 }
  0xa8   : > { %s4187_s13 = scalar_select %p3651_p7, 1, 0 }
  0xa9   : > { %s4188_s28 = scalar_select %p3655_p6, 1, 0 }
  0xaa   : > { %p2973_p10 = scmp.lt.s32.totalorder %s3395_s12, 2  ;;  %s3661_s17 = sand.u32 1, %s3391_s11  }
  0xab   : > { %p3663_p11 = por %p258_p9, %p50_p13  ;;  %s2710_s22 = sshll.u32 %s3661_s17, 4 }
  0xac   : > { %s2790_s14 = sshll.u32 %s3395_s12, 8  ;;  %s4190_s0 = sld [smem:[#allocation21_spill]] }
  0xad   : > { %s4189_s19 = scalar_select %p3663_p11, 1, 0 }
  0xae   : > { %s342_s24 = scalar_lea.vmem [#allocation2], %s2710_s22  ;;  %p3674_p12 = pnand %p2973_p10, %p46_p2 }
  0xaf   : > { %s349_s25 = sshll.u32 %s342_s24, 4  ;;  %s3678_s25 = int_to_ptr.vmem [resolvable:$true] %s349_s25 }
  0xb0   : > { %p3255_p8 = pneg %p3674_p12 }
  0xb2   : > { %s3672_s20 = scalar_lea.hbm %s4190_s0, %s2790_s14  ;;  %s3258_s18 = scalar_lea.hbm %s4190_s0, 512 }
  0xb3   : > { %s3253_s26 = scalar_lea.hbm %s3672_s20, 256  ;;  %p3259_p13 = scmp.lt.u32.totalorder %s3672_s20, %s4190_s0 }
  0xb4   : > { %p3254_p4 = scmp.ne.s32.totalorder %s3672_s20, %s3253_s26  ;;  %p3260_p0 = scmp.lt.u32.totalorder %s3258_s18, %s3253_s26 }
  0xb5   : > { %p3262_p5 = scmp.lt.u32.totalorder %s3253_s26, %s3672_s20 }
  0xb6   : > { %p3256_p1 = pnand %p3255_p8, %p3254_p4  ;;  %p3261_p2 = por %p3260_p0, %p3259_p13 }
  0xb8   : > { %p3257_p3 = pneg %p3256_p1  ;;  %p3263_p9 = por %p3262_p5, %p3261_p2 }
  0xba   : > { %p3264_p10 = pnand %p3263_p9, %p3257_p3 }
  0xbc   : > { %3267 = shalt.err (!%p3264_p10)
}
  0xbd   : > { %s3268_s29 = scalar_lea.vmem %s3678_s25, 256  ;;  %s3404_s14 = smov [#allocation2]  }
  0xbe   : > { %p3269_p4 = scmp.ne.s32.totalorder %s3678_s25, %s3268_s29  ;;  %s3273_s22 = sshll.u32 %s3404_s14, 4  ;;  %s3274_s22 = int_to_ptr.vmem [resolvable:$false] %s3273_s22 }
  0xbf   : > { %s3275_s23 = scalar_lea.vmem %s3274_s22, 512  ;;  %p3276_p6 = scmp.lt.s32.totalorder %s3678_s25, %s3274_s22 }
  0xc0   : > { %p3271_p1 = pnand %p3269_p4, %p3255_p8  ;;  %p3277_p13 = scmp.lt.s32.totalorder %s3275_s23, %s3268_s29 }
  0xc2   : > { %p3272_p11 = pneg %p3271_p1  ;;  %p3278_p0 = por %p3277_p13, %p3276_p6 }
  0xc4   : > { %p3279_p2 = pnand %p3278_p0, %p3272_p11 }
  0xc6   : > { %3282 = shalt.err (!%p3279_p2)
}
  0xc7   : > { %s3405_s26 = smov 128   ;;  %s3406_s18 = smov 8  }
  0xc8   : > { %s4192_s24 = scalar_lea.sflag [#allocation3], %s3661_s17  ;;  %s359_s14 = sand.u32 1, %s3395_s12  }
  0xc9   : > { %2960 = dma.hbm_to_vmem [thread:$0]  (!%p3674_p12), %s3672_s20, 256, %s3678_s25, %s4192_s24, %s3405_s26, %s3405_s26, %s3406_s18  }
  0xca   : > { %s2713_s0 = sshll.u32 %s3395_s12, 4  ;;  %s362_s4 = scalar_lea.vmem [#allocation5], %s3661_s17 }
  0xcb   : > { %s3713_s23 = scalar_lea.hbm %s4159_s1, %s2713_s0  ;;  %s369_s5 = sshll.u32 %s362_s4, 4  ;;  %s370_s5 = int_to_ptr.vmem [resolvable:$true] %s369_s5 }
  0xcc   : > { %s360_s6 = scalar_lea.sflag [#allocation6], %s359_s14  ;;  %s3283_s7 = scalar_lea.hbm %s3713_s23, 16 }
  0xcd   : > { %p3284_p6 = scmp.ne.s32.totalorder %s3713_s23, %s3283_s7  ;;  %s3288_s26 = scalar_lea.hbm %s4159_s1, 32 }
  0xce   : > { %p3289_p5 = scmp.lt.u32.totalorder %s3713_s23, %s4159_s1  ;;  %p3290_p9 = scmp.lt.u32.totalorder %s3288_s26, %s3283_s7 }
  0xcf   : > { %p3286_p11 = pnand %p3284_p6, %p3255_p8  ;;  %p3292_p4 = scmp.lt.u32.totalorder %s3283_s7, %s3713_s23 }
  0xd0   : > { %p3291_p10 = por %p3290_p9, %p3289_p5 }
  0xd1   : > { %p3287_p3 = pneg %p3286_p11 }
  0xd2   : > { %p3293_p1 = por %p3292_p4, %p3291_p10 }
  0xd4   : > { %p3294_p13 = pnand %p3293_p1, %p3287_p3 }
  0xd6   : > { %3297 = shalt.err (!%p3294_p13)
}
  0xd7   : > { %s3298_s4 = scalar_lea.vmem %s370_s5, 16  ;;  %s3407_s17 = smov [#allocation5]  }
  0xd8   : > { %p3299_p0 = scmp.ne.s32.totalorder %s370_s5, %s3298_s4  ;;  %s3303_s24 = sshll.u32 %s3407_s17, 4  ;;  %s3304_s24 = int_to_ptr.vmem [resolvable:$false] %s3303_s24 }
  0xd9   : > { %s3305_s14 = scalar_lea.vmem %s3304_s24, 32  ;;  %p3306_p11 = scmp.lt.s32.totalorder %s370_s5, %s3304_s24 }
  0xda   : > { %p3301_p2 = pnand %p3299_p0, %p3255_p8  ;;  %p3307_p7 = scmp.lt.s32.totalorder %s3305_s14, %s3298_s4 }
  0xdc   : > { %p3302_p6 = pneg %p3301_p2  ;;  %p3308_p5 = por %p3307_p7, %p3306_p11 }
  0xde   : > { %p3309_p9 = pnand %p3308_p5, %p3302_p6 }
  0xe0   : > { %3312 = shalt.err (!%p3309_p9)
}
  0xe1   : > { %2963 = dma.hbm_to_vmem [thread:$0]  (!%p3674_p12), %s3713_s23, 16, %s370_s5, %s360_s6  }
  0xe2   : > { %p4193_p3 = scmp.ne.s32.totalorder %s4178_s16, 0 }
  0xe3   : > { %s3738_s7 = sand.u32 (!%p4193_p3), 1, %s3387_s10   ;;  %p4194_p7 = scmp.ne.s32.totalorder (!%p4193_p3), %s4187_s13, 0 }
  0xe4   : > { %386 = sbr.rel (%p4193_p3) target bundleno = 2112 (0x840), region = 56  ;;  %s2715_s22 = sshll.u32 (!%p4193_p3), %s3738_s7, 4 }
  0xe5   : > { %s389_s29 = scalar_lea.sflag (!%p4193_p3), [#allocation3], %s3738_s7  ;;  %s392_s20 = scalar_lea.vmem (!%p4193_p3), [#allocation2], %s2715_s22 }
  0xeb   : > { %3358 = dma.done.wait (%p4194_p7), %s389_s29, 256  }
  0xec   : > { %3360 = vsyncadd (%p4194_p7), %s389_s29, 4294967040  ;;  %s397_s5 = sand.u32 1, %s3492_s15   ;;  %s400_s16 = scalar_lea.vmem [#allocation5], %s3738_s7 }
  0xed   : > { %s398_s6 = scalar_lea.sflag [#allocation6], %s397_s5 }
  0xee   : > { %3362 = dma.done.wait (%p4194_p7), %s398_s6, 16  }
  0xef   : > { %3364 = vsyncadd (%p4194_p7), %s398_s6, 4294967280  ;;  %p4195_p12 = scmp.eq.s32.totalorder %s3492_s15, 0 }
  0xf1   : > { %3366 = dma.done.wait (%p4195_p12), [#allocation6], 16   ;;  %p4196_p8 = pmov %p4195_p12 }
  0xf3   : > { %3368 = vsyncadd (%p4196_p8), [#allocation6], 4294967280  ;;  %p4197_p10 = pmov %p4196_p8 }
  0xf4   : > { %p4198_p4 = pmov %p4196_p8 }
  0xf5   : > { %3370 = dma.done.wait (%p4197_p10), [#allocation9], 3088  }
  0xf6   : > { %3372 = vsyncadd (%p4198_p4), [#allocation9], 4294964208  ;;  %p4199_p1 = pmov %p4198_p4 }
  0xf8   : > { %3374 = dma.done.wait (%p4199_p1), [#allocation12], 32   ;;  %p4200_p13 = pmov %p4199_p1 }
  0xf9   : > { %v3766_v0 = vld [vmem:[%s392_s20] sm:$0xff]  ;;  %v3768_v1 = vld [vmem:[%s392_s20 + $0x8] sm:$0xff]  ;;  %v3408_v7 = vmov 0.0   ;;  %v3409_v24 = vmov 0   ;;  %vm3410_vm0 = vmmov 0   ;;  %p464_p0 = scmp.lt.s32.totalorder %s3492_s15, 1 }
  0xfa   : > { %3376 = vsyncadd (%p4200_p13), [#allocation12], 4294967264  ;;  %475 = vadd.xlane.f32.xlu0 %v3766_v0  ;;  %v482_v2 = vmul.f32 %v3766_v0, %v3766_v0  ;;  %v483_v3 = vmul.f32 %v3768_v1, %v3768_v1  ;;  %v3037_v4 = vld [vmem:[#allocation10 + $0x4] ss:$12 sps:$4 sm:$0xff]   ;;  %v3039_v5 = vld [vmem:[#allocation10] ss:$12 sps:$4 sm:$0xff]   ;;  %2827 = vmatprep.subr.bf16.mxu1 %v3408_v7 }
  0xfb   : > { %v3040_v6 = vld [vmem:[#allocation10 + $0x8] ss:$12 sps:$4 sm:$0xff]   ;;  %681 = vmatprep.subr.bf16.mxu0 %v3037_v4  ;;  %v3043_v9 = vld [vmem:[#allocation10 + $0x18] ss:$12 sps:$4 sm:$0xff]   ;;  %v3044_v10 = vld [vmem:[#allocation10 + $0x20] ss:$12 sps:$4 sm:$0xff]   ;;  %713 = vmatprep.mubr.bf16.mxu0 %v3409_v24 }
  0xfc   : > { %484 = vadd.xlane.f32.xlu1 %v482_v2  ;;  %682 = vmatpush1.bf16.msra.mxu0 %v3039_v5  ;;  %v3041_v8 = vld [vmem:[#allocation10 + $0x1c] ss:$12 sps:$4 sm:$0xff]   ;;  %v3045_v11 = vld [vmem:[#allocation10 + $0x34] ss:$12 sps:$4 sm:$0xff]   ;;  %v3048_v13 = vld [vmem:[#allocation10 + $0x38] ss:$12 sps:$4 sm:$0xff]  }
  0xfd   : > { %2828 = vmatpush3.bf16.msra.mxu1 %v3040_v6  ;;  %683 = vmatprep.subr.bf16.mxu0 %v3041_v8  ;;  %v3047_v12 = vld [vmem:[#allocation10 + $0x30] ss:$12 sps:$4 sm:$0xff]   ;;  %v3049_v14 = vld [vmem:[#allocation10 + $0x4c] ss:$12 sps:$4 sm:$0xff]   ;;  %v3051_v15 = vld [vmem:[#allocation10 + $0x48] ss:$12 sps:$4 sm:$0xff]  }
  0xfe   : > { %477 = vadd.xlane.f32.xlu0 %v3768_v1  ;;  %2829 = vmatprep.subr.bf16.mxu1 %v3408_v7  ;;  %v3052_v16 = vld [vmem:[#allocation10 + $0x50] ss:$12 sps:$4 sm:$0xff]   ;;  %v3055_v18 = vld [vmem:[#allocation10 + $0x60] ss:$12 sps:$4 sm:$0xff]   ;;  %v3056_v19 = vld [vmem:[#allocation10 + $0x68] ss:$12 sps:$4 sm:$0xff]  }
  0xff   : > { %v3053_v17 = vld [vmem:[#allocation10 + $0x64] ss:$12 sps:$4 sm:$0xff]   ;;  %v3057_v20 = vld [vmem:[#allocation10 + $0x7c] ss:$12 sps:$4 sm:$0xff]   ;;  %v3060_v22 = vld [vmem:[#allocation10 + $0x80] ss:$12 sps:$4 sm:$0xff]   ;;  %2843 = vmatprep.mubr.msk.bf16.mxu1 %vm3410_vm0, %v3408_v7  ;;  %3033 = vset.pattern.permute.xlu0 %v3409_v24 }
 0x100   : > { %486 = vadd.xlane.f32.xlu1 %v483_v3  ;;  %684 = vmatpush1.bf16.msra.mxu0 %v3043_v9  ;;  %v3059_v21 = vld [vmem:[#allocation10 + $0x78] ss:$12 sps:$4 sm:$0xff]   ;;  %v3061_v23 = vld [vmem:[#allocation10 + $0x94] ss:$12 sps:$4 sm:$0xff]   ;;  %v3063_v25 = vld [vmem:[#allocation10 + $0x90] ss:$12 sps:$4 sm:$0xff]  }
 0x101   : > { %2830 = vmatpush3.bf16.msra.mxu1 %v3044_v10  ;;  %685 = vmatprep.subr.bf16.mxu0 %v3045_v11  ;;  %v3064_v26 = vld [vmem:[#allocation10 + $0x98] ss:$12 sps:$4 sm:$0xff]   ;;  %v3067_v28 = vld [vmem:[#allocation10 + $0xa8] ss:$12 sps:$4 sm:$0xff]   ;;  %v3068_v29 = vld [vmem:[#allocation10 + $0xb0] ss:$12 sps:$4 sm:$0xff]  }
 0x102   : > { %2831 = vmatprep.subr.bf16.mxu1 %v3408_v7  ;;  %3034 = vset.pattern.permute.xlu1 %v3409_v24  ;;  %v3065_v27 = vld [vmem:[#allocation10 + $0xac] ss:$12 sps:$4 sm:$0xff]   ;;  %v2724_v49 = vld [vmem:[#allocation7] ss:$0 sm:$0xff]  ;;  %v2725_v54 = vld [vmem:[#allocation8] ss:$0 sm:$0xff] }
 0x103   : > { %s465_s13 = scalar_select %p464_p0, %s3492_s15, 1  ;;  %vm1666_vm1 = vcmask 261120   ;;  %vm1855_vm4 = vcmask 130048   ;;  %vm2422_vm5 = vcmask 523264   ;;  %vm2425_vm6 = vcmask 785408  }
 0x104   : > { %686 = vmatpush1.bf16.msra.mxu0 %v3047_v12  ;;  %s3411_s3 = smov 64   ;;  %s3412_s23 = smov 96  }
 0x105   : > { %2832 = vmatpush3.bf16.msra.mxu1 %v3048_v13  ;;  %687 = vmatprep.subr.bf16.mxu0 %v3049_v14  ;;  %s2791_s25 = sshll.u32 %s465_s13, 4  ;;  %s3413_s26 = smov 32  }
 0x106   : > { %2833 = vmatprep.subr.bf16.mxu1 %v3408_v7  ;;  %s468_s4 = scalar_lea.vmem %s4160_s2, %s2791_s25  ;;  %s2792_s20 = sshll.u32 %s3492_s15, 8 }
 0x107   : > { %s4114_s5 = scalar_lea.hbm %s4167_s9, %s2792_s20  ;;  %s2537_s6 = scalar_lea.sflag [#allocation4], %s3738_s7 }
 0x108   : > { %688 = vmatpush1.bf16.msra.mxu0 %v3051_v15  ;;  %p4201_p6 = scmp.ne.s32.totalorder %s4188_s28, 0  ;;  %s3418_s15 = smov [#allocation14]  }
 0x109   : > { %2834 = vmatpush3.bf16.msra.mxu1 %v3052_v16  ;;  %689 = vmatprep.subr.bf16.mxu0 %v3053_v17 }
 0x10a   : > { %2835 = vmatprep.subr.bf16.mxu1 %v3408_v7 }
 0x10c   : > { %690 = vmatpush1.bf16.msra.mxu0 %v3055_v18 }
 0x10d   : > { %2836 = vmatpush3.bf16.msra.mxu1 %v3056_v19  ;;  %691 = vmatprep.subr.bf16.mxu0 %v3057_v20 }
 0x10e   : > { %2837 = vmatprep.subr.bf16.mxu1 %v3408_v7 }
 0x110   : > { %692 = vmatpush1.bf16.msra.mxu0 %v3059_v21 }
 0x111   : > { %2838 = vmatpush3.bf16.msra.mxu1 %v3060_v22  ;;  %693 = vmatprep.subr.bf16.mxu0 %v3061_v23 }
 0x112   : > { %2839 = vmatprep.subr.bf16.mxu1 %v3408_v7 }
 0x114   : > { %694 = vmatpush1.bf16.msra.mxu0 %v3063_v25 }
 0x115   : > { %2840 = vmatpush3.bf16.msra.mxu1 %v3064_v26  ;;  %695 = vmatprep.subr.bf16.mxu0 %v3065_v27 }
 0x116   : > { %2841 = vmatprep.subr.bf16.mxu1 %v3408_v7 }
 0x118   : > { %696 = vmatpush1.bf16.msra.mxu0 %v3067_v28 }
 0x119   : > { %2842 = vmatpush3.bf16.msra.mxu1 %v3068_v29  ;;  %2871 = vmatprep.subr.bf16.mxu0 %v3408_v7 }
 0x11a   : > { %2847 = vmatprep.subr.bf16.mxu1 %v3408_v7 }
 0x187   : > { %v476_v30 = vpop.xlane.xlu0 %475 }
 0x188   : > { %v480_v31 = vmul.f32 0.0078125, %v476_v30 }
 0x189   : > { %v485_v32 = vpop.xlane.xlu1 %484 }
 0x18a   : > { %v490_v33 = vmul.f32 %v480_v31, %v480_v31  ;;  %v488_v34 = vmul.f32 0.0078125, %v485_v32  ;;  %v496_v46 = vsub.f32 %v3766_v0, %v480_v31 }
 0x18b   : > { %v478_v35 = vpop.xlane.xlu0 %477 }
 0x18c   : > { %v492_v36 = vsub.f32 %v488_v34, %v490_v33  ;;  %v481_v37 = vmul.f32 0.0078125, %v478_v35 }
 0x18d   : > { %v487_v38 = vpop.xlane.xlu1 %486 }
 0x18e   : > { %v494_v39 = vmax.f32 %v492_v36, 0.0  ;;  %v491_v40 = vmul.f32 %v481_v37, %v481_v37  ;;  %v489_v41 = vmul.f32 0.0078125, %v487_v38  ;;  %v497_v50 = vsub.f32 %v3768_v1, %v481_v37 }
 0x190   : > { %v498_v42 = vadd.f32 1e-05, %v494_v39  ;;  %v493_v43 = vsub.f32 %v489_v41, %v491_v40 }
 0x192   : > { %3077 = vrsqrt.f32 %v498_v42  ;;  %v495_v44 = vmax.f32 %v493_v43, 0.0 }
 0x194   : > { %v499_v45 = vadd.f32 1e-05, %v495_v44 }
 0x196   : > { %3079 = vrsqrt.f32 %v499_v45 }
 0x19c   : > { %v3078_v47 = vpop.eup %3077 }
 0x19d   : > { %v502_v48 = vmul.f32 %v3078_v47, %v496_v46  ;;  %v2751_v47 = vld [vmem:[#allocation13] ss:$0 sm:$0xff] }
 0x19f   : > { %v510_v53 = vmul.f32 %v2724_v49, %v502_v48 }
 0x1a0   : > { %v3080_v51 = vpop.eup %3079 }
 0x1a1   : > { %v503_v52 = vmul.f32 %v3080_v51, %v497_v50  ;;  %v518_v56 = vadd.f32 %v2725_v54, %v510_v53 }
 0x1a3   : > { %v511_v55 = vmul.f32 %v2724_v49, %v503_v52 }
 0x1a5   : > { %v519_v57 = vadd.f32 %v2725_v54, %v511_v55 }
 0x1a7   : > { %v520_v58 = vpack.c.bf16 %v519_v57, %v518_v56  ;;  %v2750_v57 = vld [vmem:[#allocation11] ss:$0 sm:$0xff] }
 0x1a9   : > { %714 = vmatmul.mubr.bf16.vlgmr.msra.gmra.mrb[0].mxu0 %v520_v58  ;;  %2844 = vmatmul.mubr.bf16.vlgmr.msra.gmra.mrb[0].mxu1 %v520_v58 }
 0x1aa   : > { %2849 = vmatprep.mubr.msk.bf16.mxu1 %vm3410_vm0, %v3408_v7  ;;  %2873 = vmatprep.mubr.msk.bf16.mxu0 %vm3410_vm0, %v3408_v7 }
 0x27c   : > { %v3797_v59 = vpop.f32.mrb[0].mxu0  ;;  %v758_v60 = vpop.f32.mrb[0].mxu1 }
 0x27d   : > { %v717_v61 = vpop.f32.mrb[1].mxu0  ;;  %v2845_v62 = vpop.f32.mrb[1].mxu1  ;;  %v772_v6 = vmul.f32 %v3797_v59, %v3797_v59 }
 0x27e   : > { %v761_v63 = vpop.f32.mrb[2].mxu1  ;;  %804 = vadd.xlane.f32.xlu0 %v717_v61  ;;  %v3799_v0 = vpop.f32.mrb[2].mxu0  ;;  %v810_v4 = vmul.f32 %v717_v61, %v717_v61  ;;  %v1649_v62 = vld [vmem:[%s468_s4] sm:$0xff] }
 0x27f   : > { %v3801_v1 = vpack.c.bf16 %v761_v63, %v758_v60  ;;  %v721_v2 = vpop.f32.mrb[3].mxu0  ;;  %v2846_v3 = vpop.f32.mrb[3].mxu1  ;;  %v773_v8 = vmul.f32 %v3799_v0, %v3799_v0  ;;  %v1650_v63 = vld [vmem:[%s468_s4 + $0x8] sm:$0xff] }
 0x280   : > { %806 = vadd.xlane.f32.xlu1 %v721_v2  ;;  %v811_v5 = vmul.f32 %v721_v2, %v721_v2  ;;  %v875_v3 = vlaneseq }
 0x282   : > { %812 = vadd.xlane.f32.xlu0 %v810_v4 }
 0x284   : > { %814 = vadd.xlane.f32.xlu1 %v811_v5  ;;  %v876_v5 = vshrl.u32 %v875_v3, 7 }
 0x286   : > { %766 = vadd.xlane.f32.xlu0 %v3797_v59 }
 0x288   : > { %768 = vadd.xlane.f32.xlu1 %v3799_v0 }
 0x28a   : > { %774 = vadd.xlane.f32.xlu0 %v772_v6  ;;  %v3415_v6 = vmov 1934713408  }
 0x28c   : > { %776 = vadd.xlane.f32.xlu1 %v773_v8  ;;  %v904_v8 = vunpack.c.l.s4 %v3415_v6 }
 0x30b   : > { %v805_v9 = vpop.xlane.xlu0 %804 }
 0x30c   : > { %v808_v10 = vmul.f32 0.0078125, %v805_v9  ;;  %v3830_v9 = vpack.i.b16 %v3409_v24, %v3409_v24 }
 0x30d   : > { %v807_v11 = vpop.xlane.xlu1 %806 }
 0x30e   : > { %v809_v12 = vmul.f32 0.0078125, %v807_v11  ;;  %v818_v14 = vmul.f32 %v808_v10, %v808_v10  ;;  %v824_v42 = vsub.f32 %v717_v61, %v808_v10 }
 0x30f   : > { %v813_v13 = vpop.xlane.xlu0 %812 }
 0x310   : > { %v816_v15 = vmul.f32 0.0078125, %v813_v13  ;;  %v819_v17 = vmul.f32 %v809_v12, %v809_v12  ;;  %v825_v44 = vsub.f32 %v721_v2, %v809_v12 }
 0x311   : > { %v815_v16 = vpop.xlane.xlu1 %814 }
 0x312   : > { %v820_v18 = vsub.f32 %v816_v15, %v818_v14  ;;  %v817_v19 = vmul.f32 0.0078125, %v815_v16 }
 0x313   : > { %v767_v20 = vpop.xlane.xlu0 %766 }
 0x314   : > { %v822_v21 = vmax.f32 %v820_v18, 0.0  ;;  %v821_v22 = vsub.f32 %v817_v19, %v819_v17  ;;  %v770_v23 = vmul.f32 0.0078125, %v767_v20  ;;  %v905_v17 = vunpack.c.0.s8 %v904_v8 }
 0x315   : > { %v769_v25 = vpop.xlane.xlu1 %768 }
 0x316   : > { %v826_v26 = vadd.f32 1e-05, %v822_v21  ;;  %v823_v27 = vmax.f32 %v821_v22, 0.0  ;;  %v771_v28 = vmul.f32 0.0078125, %v769_v25  ;;  %v780_v31 = vmul.f32 %v770_v23, %v770_v23 }
 0x317   : > { %v775_v29 = vpop.xlane.xlu0 %774  ;;  %v786_v51 = vsub.f32 %v3797_v59, %v770_v23  ;;  %v3837_v25 = vsub.s32 %v905_v17, %v876_v5 }
 0x318   : > { %3081 = vrsqrt.f32 %v826_v26  ;;  %v827_v30 = vadd.f32 1e-05, %v823_v27  ;;  %v778_v32 = vmul.f32 0.0078125, %v775_v29  ;;  %v781_v34 = vmul.f32 %v771_v28, %v771_v28 }
 0x319   : > { %v777_v33 = vpop.xlane.xlu1 %776  ;;  %v787_v54 = vsub.f32 %v3799_v0, %v771_v28  ;;  %v3414_v0 = vmov 1983009808  }
 0x31a   : > { %3083 = vrsqrt.f32 %v827_v30  ;;  %v782_v35 = vsub.f32 %v778_v32, %v780_v31  ;;  %v779_v36 = vmul.f32 0.0078125, %v777_v33  ;;  %v873_v2 = vunpack.c.l.s4 %v3414_v0 }
 0x31c   : > { %v784_v37 = vmax.f32 %v782_v35, 0.0  ;;  %v783_v38 = vsub.f32 %v779_v36, %v781_v34  ;;  %v874_v4 = vunpack.c.0.s8 %v873_v2 }
 0x31e   : > { %v788_v39 = vadd.f32 1e-05, %v784_v37  ;;  %v785_v40 = vmax.f32 %v783_v38, 0.0  ;;  %v3832_v15 = vsub.s32 %v874_v4, %v876_v5 }
 0x320   : > { %3085 = vrsqrt.f32 %v788_v39  ;;  %v789_v41 = vadd.f32 1e-05, %v785_v40 }
 0x322   : > { %v3082_v43 = vpop.eup %3081  ;;  %3087 = vrsqrt.f32 %v789_v41 }
 0x323   : > { %v830_v45 = vmul.f32 %v3082_v43, %v824_v42 }
 0x324   : > { %v3084_v46 = vpop.eup %3083 }
 0x325   : > { %v831_v48 = vmul.f32 %v3084_v46, %v825_v44  ;;  %v838_v49 = vmul.f32 %v2751_v47, %v830_v45 }
 0x327   : > { %v839_v50 = vmul.f32 %v2751_v47, %v831_v48 }
 0x329   : > { %v840_v52 = vpack.c.bf16 %v839_v50, %v838_v49 }
 0x32a   : > { %v3086_v53 = vpop.eup %3085 }
 0x32b   : > { %v792_v55 = vmul.f32 %v3086_v53, %v786_v51  ;;  %1118 = vrot.lane.b32.xlu1 %v840_v52, %s3411_s3  ;;  %1116 = vrot.lane.b32.xlu0 %v840_v52, %s3412_s23  ;;  %v1126_v13 = vshrl.u32 %v840_v52, 16 }
 0x32c   : > { %v3088_v56 = vpop.eup %3087 }
 0x32d   : > { %v793_v58 = vmul.f32 %v3088_v56, %v787_v54  ;;  %v800_v59 = vmul.f32 %v2750_v57, %v792_v55 }
 0x32f   : > { %1120 = vrot.lane.b32.xlu1 %v840_v52, %s3413_s26  ;;  %v801_v60 = vmul.f32 %v2750_v57, %v793_v58 }
 0x331   : > { %v802_v61 = vpack.c.bf16 %v801_v60, %v800_v59 }
 0x333   : > { %845 = vrot.lane.b32.xlu0 %v802_v61, %s3411_s3  ;;  %843 = vrot.lane.b32.xlu1 %v802_v61, %s3412_s23  ;;  %v853_v31 = vshrl.u32 %v802_v61, 16 }
 0x337   : > { %1653 = vperm.xlu0 %3033, %v1649_v62   ;;  %847 = vrot.lane.b32.xlu1 %v802_v61, %s3413_s26 }
 0x33b   : > { %1385 = vrot.lane.b32.xlu0 %v3801_v1, %s3411_s3  ;;  %1656 = vperm.xlu1 %3034, %v1650_v63  }
 0x33f   : > { %1383 = vrot.lane.b32.xlu1 %v3801_v1, %s3412_s23 }
 0x343   : > { %1387 = vrot.lane.b32.xlu1 %v3801_v1, %s3413_s26 }
 0x39d   : > { %v1117_v10 = vpop.permute.xlu0 %1116  ;;  %v1119_v11 = vpop.permute.xlu1 %1118 }
 0x39e   : > { %v1124_v12 = vpack.i.b16 %v1117_v10, %v840_v52  ;;  %v1127_v14 = vshrl.u32 %v1117_v10, 16  ;;  %v1134_v22 = vshrl.u32 %v1119_v11, 16 }
 0x3a0   : > { %v1128_v16 = vpack.i.b16 %v1127_v14, %v1126_v13  ;;  %v1138_v18 = vcombine.high %v1124_v12, %v3830_v9  ;;  %v1145_v24 = vrot.slane %v1124_v12, %v3832_v15 }
 0x3a1   : > { %v1121_v19 = vpop.permute.xlu1 %1120 }
 0x3a2   : > { %v1204_v20 = vcombine.high %v1128_v16, %v3830_v9  ;;  %v1132_v21 = vpack.i.b16 %v1121_v19, %v1119_v11  ;;  %v1135_v23 = vshrl.u32 %v1121_v19, 16  ;;  %v1152_v28 = vrot.slane %v1138_v18, %v3832_v15 }
 0x3a3   : > { %v1211_v29 = vrot.slane %v1128_v16, %v3832_v15 }
 0x3a4   : > { %v1153_v26 = vcombine.high %v1132_v21, %v3830_v9  ;;  %v1160_v27 = vrot.slane %v1132_v21, %v3832_v15  ;;  %v1136_v30 = vpack.i.b16 %v1135_v23, %v1134_v22  ;;  %v1218_v33 = vrot.slane %v1204_v20, %v3832_v15 }
 0x3a5   : > { %v844_v32 = vpop.permute.xlu1 %843  ;;  %v846_v53 = vpop.permute.xlu0 %845 }
 0x3a6   : > { %v1167_v34 = vrot.slane %v1153_v26, %v3832_v15  ;;  %v1168_v35 = vcombine.low %v1145_v24, %v1160_v27  ;;  %v1169_v36 = vcombine.high %v1145_v24, %v1160_v27  ;;  %v1219_v37 = vcombine.high %v1136_v30, %v3830_v9 }
 0x3a7   : > { %v1226_v38 = vrot.slane %v1136_v30, %v3832_v15  ;;  %v851_v39 = vpack.i.b16 %v844_v32, %v802_v61  ;;  %v854_v40 = vshrl.u32 %v844_v32, 16  ;;  %v861_v62 = vshrl.u32 %v846_v53, 16 }
 0x3a8   : > { %v1176_v41 = vrot.slane %v1168_v35, %v3837_v25  ;;  %v1183_v42 = vrot.slane %v1169_v36, %v3837_v25  ;;  %v1184_v43 = vcombine.low %v1152_v28, %v1167_v34  ;;  %v1185_v44 = vcombine.high %v1152_v28, %v1167_v34 }
 0x3a9   : > { %v1233_v45 = vrot.slane %v1219_v37, %v3832_v15  ;;  %v1234_v46 = vcombine.low %v1211_v29, %v1226_v38  ;;  %v1235_v47 = vcombine.high %v1211_v29, %v1226_v38  ;;  %v855_v48 = vpack.i.b16 %v854_v40, %v853_v31  ;;  %v848_v60 = vpop.permute.xlu1 %847 }
 0x3aa   : > { %v1192_v49 = vrot.slane %v1184_v43, %v3837_v25  ;;  %v1199_v50 = vrot.slane %v1185_v44, %v3837_v25  ;;  %v1270_v51 = vcombine.low %v1176_v41, %v1183_v42  ;;  %v2756_v52 = vcombine.high %v1176_v41, %v1183_v42 }
 0x3ab   : > { %v1242_v54 = vrot.slane %v1234_v46, %v3837_v25  ;;  %v1249_v55 = vrot.slane %v1235_v47, %v3837_v25  ;;  %v1250_v56 = vcombine.low %v1218_v33, %v1233_v45  ;;  %v1251_v57 = vcombine.high %v1218_v33, %v1233_v45 }
 0x3ac   : > { %v1286_v58 = vcombine.low %v1192_v49, %v1199_v50  ;;  %v2757_v59 = vcombine.high %v1192_v49, %v1199_v50  ;;  %v3855_v61 = vrot.slane %v1270_v51, %v3832_v15  ;;  %v871_v2 = vcombine.high %v851_v39, %v3830_v9 }
 0x3ad   : > { %v1258_v63 = vrot.slane %v1250_v56, %v3837_v25  ;;  %v1265_v0 = vrot.slane %v1251_v57, %v3837_v25  ;;  %v937_v3 = vcombine.high %v855_v48, %v3830_v9  ;;  %v3862_v4 = vrot.slane %v2756_v52, %v3832_v15 }
 0x3ae   : > { %v1320_v5 = vcombine.low %v1242_v54, %v1249_v55  ;;  %v859_v6 = vpack.i.b16 %v848_v60, %v846_v53  ;;  %v862_v8 = vshrl.u32 %v848_v60, 16  ;;  %v2758_v10 = vcombine.high %v1242_v54, %v1249_v55 }
 0x3af   : > { %v878_v11 = vrot.slane %v851_v39, %v3832_v15  ;;  %v1293_v12 = vrot.slane %v1286_v58, %v3832_v15  ;;  %v1301_v13 = vrot.slane %v2757_v59, %v3832_v15  ;;  %v944_v14 = vrot.slane %v855_v48, %v3832_v15 }
 0x3b0   : > { %v863_v16 = vpack.i.b16 %v862_v8, %v861_v62  ;;  %v886_v17 = vcombine.high %v859_v6, %v3830_v9  ;;  %v893_v18 = vrot.slane %v859_v6, %v3832_v15  ;;  %v1336_v19 = vcombine.low %v1258_v63, %v1265_v0 }
 0x3b1   : > { %v2759_v20 = vcombine.high %v1258_v63, %v1265_v0  ;;  %v885_v21 = vrot.slane %v871_v2, %v3832_v15  ;;  %v951_v22 = vrot.slane %v937_v3, %v3832_v15  ;;  %v1302_v29 = vcombine.low %v3855_v61, %v3862_v4 }
 0x3b2   : > { %v900_v23 = vrot.slane %v886_v17, %v3832_v15  ;;  %v901_v24 = vcombine.low %v878_v11, %v893_v18  ;;  %v902_v26 = vcombine.high %v878_v11, %v893_v18  ;;  %v952_v27 = vcombine.high %v863_v16, %v3830_v9 }
 0x3b3   : > { %v959_v28 = vrot.slane %v863_v16, %v3832_v15  ;;  %v1310_v30 = vcombine.low %v1293_v12, %v1301_v13  ;;  %v1327_v31 = vrot.slane %v1320_v5, %v3832_v15  ;;  %v1335_v39 = vrot.slane %v2758_v10, %v3832_v15 }
 0x3b4   : > { %v909_v32 = vrot.slane %v901_v24, %v3837_v25  ;;  %v916_v33 = vrot.slane %v902_v26, %v3837_v25  ;;  %v917_v34 = vcombine.low %v885_v21, %v900_v23  ;;  %v918_v35 = vcombine.high %v885_v21, %v900_v23 }
 0x3b5   : > { %v966_v36 = vrot.slane %v952_v27, %v3832_v15  ;;  %v967_v37 = vcombine.low %v944_v14, %v959_v28  ;;  %v968_v38 = vcombine.high %v944_v14, %v959_v28  ;;  %v1343_v60 = vrot.slane %v1336_v19, %v3832_v15 }
 0x3b6   : > { %v925_v40 = vrot.slane %v917_v34, %v3837_v25  ;;  %v932_v41 = vrot.slane %v918_v35, %v3837_v25  ;;  %v1003_v42 = vcombine.low %v909_v32, %v916_v33  ;;  %v2752_v43 = vcombine.high %v909_v32, %v916_v33  ;;  %v3890_v56 = vpop.permute.xlu0 %1653 }
 0x3b7   : > { %v975_v44 = vrot.slane %v967_v37, %v3837_v25  ;;  %v982_v45 = vrot.slane %v968_v38, %v3837_v25  ;;  %v983_v46 = vcombine.low %v951_v22, %v966_v36  ;;  %v984_v47 = vcombine.high %v951_v22, %v966_v36 }
 0x3b8   : > { %v1010_v48 = vrot.slane %v1003_v42, %v3832_v15  ;;  %v1018_v49 = vrot.slane %v2752_v43, %v3832_v15  ;;  %v1019_v50 = vcombine.low %v925_v40, %v932_v41  ;;  %v2753_v51 = vcombine.high %v925_v40, %v932_v41 }
 0x3b9   : > { %v991_v52 = vrot.slane %v983_v46, %v3837_v25  ;;  %v998_v53 = vrot.slane %v984_v47, %v3837_v25  ;;  %v1053_v54 = vcombine.low %v975_v44, %v982_v45  ;;  %v2754_v55 = vcombine.high %v975_v44, %v982_v45 }
 0x3ba   : > { %v3892_v57 = vpop.permute.xlu1 %1656  ;;  %v1026_v58 = vrot.slane %v1019_v50, %v3832_v15  ;;  %v1034_v59 = vrot.slane %v2753_v51, %v3832_v15  ;;  %v1351_v61 = vrot.slane %v2759_v20, %v3832_v15  ;;  %v1035_v3 = vcombine.low %v1010_v48, %v1018_v49  ;;  %v1386_v19 = vpop.permute.xlu0 %1385 }
 0x3bb   : > { %v1060_v62 = vrot.slane %v1053_v54, %v3832_v15  ;;  %v1068_v63 = vrot.slane %v2754_v55, %v3832_v15  ;;  %v1069_v0 = vcombine.low %v991_v52, %v998_v53  ;;  %v2755_v2 = vcombine.high %v991_v52, %v998_v53 }
 0x3bc   : > { %v1043_v4 = vcombine.low %v1026_v58, %v1034_v59  ;;  %v3901_v5 = vrot.slane %v1310_v30, %v3837_v25  ;;  %v1393_v11 = vshrl.u32 %v3801_v1, 16  ;;  %v3907_v13 = vrot.slane %v1302_v29, %v3837_v25 }
 0x3bd   : > { %v1076_v6 = vrot.slane %v1069_v0, %v3832_v15  ;;  %v1084_v8 = vrot.slane %v2755_v2, %v3832_v15  ;;  %v1085_v10 = vcombine.low %v1060_v62, %v1068_v63  ;;  %v1352_v14 = vcombine.low %v1327_v31, %v1335_v39 }
 0x3be   : > { %v1384_v12 = vpop.permute.xlu1 %1383  ;;  %v1360_v16 = vcombine.low %v1343_v60, %v1351_v61  ;;  %v3911_v21 = vrot.slane %v1043_v4, %v3837_v25  ;;  %v3914_v22 = vrot.slane %v1035_v3, %v3837_v25  ;;  %v1318_v23 = vcombine.low %v3907_v13, %v3901_v5 }
 0x3bf   : > { %v1391_v17 = vpack.i.b16 %v1384_v12, %v3801_v1  ;;  %v1093_v18 = vcombine.low %v1076_v6, %v1084_v8  ;;  %v1394_v20 = vshrl.u32 %v1384_v12, 16  ;;  %v1359_v24 = vrot.slane %v1352_v14, %v3837_v25 }
 0x3c0   : > { %v1367_v26 = vrot.slane %v1360_v16, %v3837_v25  ;;  %v3922_v28 = vrot.slane %v1085_v10, %v3837_v25  ;;  %v1401_v31 = vshrl.u32 %v1386_v19, 16  ;;  %v3931_v37 = vcombine.low %v3914_v22, %v3911_v21 }
 0x3c1   : > { %v1395_v27 = vpack.i.b16 %v1394_v20, %v1393_v11  ;;  %v1405_v1 = vcombine.high %v1391_v17, %v3830_v9  ;;  %v3925_v29 = vrot.slane %v1093_v18, %v3837_v25  ;;  %v1412_v35 = vrot.slane %v1391_v17, %v3832_v15 }
 0x3c2   : > { %v1388_v30 = vpop.permute.xlu1 %1387  ;;  %v1368_v32 = vcombine.low %v1359_v24, %v1367_v26  ;;  %v1373_v45 = vshrl.u32 %v1318_v23, 16 }
 0x3c3   : > { %v1399_v33 = vpack.i.b16 %v1388_v30, %v1386_v19  ;;  %v1402_v34 = vshrl.u32 %v1388_v30, 16  ;;  %v1471_v36 = vcombine.high %v1395_v27, %v3830_v9  ;;  %v3935_v38 = vcombine.low %v3922_v28, %v3925_v29 }
 0x3c4   : > { %v1372_v39 = vpack.i.b16 %v1368_v32, %v1318_v23  ;;  %v1419_v43 = vrot.slane %v1405_v1, %v3832_v15  ;;  %v1478_v44 = vrot.slane %v1395_v27, %v3832_v15  ;;  %v1374_v46 = vshrl.u32 %v1368_v32, 16 }
 0x3c5   : > { %v1403_v40 = vpack.i.b16 %v1402_v34, %v1401_v31  ;;  %v1420_v41 = vcombine.high %v1399_v33, %v3830_v9  ;;  %v1427_v42 = vrot.slane %v1399_v33, %v3832_v15  ;;  %v1485_v51 = vrot.slane %v1471_v36, %v3832_v15 }
 0x3c6   : > { %v1671_v47 = vsel %vm1666_vm1, %v1372_v39, 0  ;;  %v1105_v52 = vpack.i.b16 %v3935_v38, %v3931_v37  ;;  %v1375_v0 = vpack.i.b16 %v1374_v46, %v1373_v45  ;;  %v1369_v30 = vcombine.high %v1359_v24, %v1367_v26 }
 0x3c7   : > { %v1434_v48 = vrot.slane %v1420_v41, %v3832_v15  ;;  %v1435_v49 = vcombine.low %v1412_v35, %v1427_v42  ;;  %v1436_v50 = vcombine.high %v1412_v35, %v1427_v42  ;;  %2848 = vmatpush3.bf16.xpose.msra.mxu1 %v1671_v47  ;;  %v1486_v53 = vcombine.high %v1403_v40, %v3830_v9 }
 0x3c8   : > { %v1493_v54 = vrot.slane %v1403_v40, %v3832_v15  ;;  %2853 = vmatprep.subr.bf16.mxu1 %v3408_v7  ;;  %v1718_v1 = vsel %vm1666_vm1, %v1375_v0, 0  ;;  %v1107_v34 = vshrl.u32 %v3935_v38, 16  ;;  %v1319_v35 = vcombine.high %v3907_v13, %v3901_v5 }
 0x3c9   : > { %v1443_v55 = vrot.slane %v1435_v49, %v3837_v25  ;;  %v1450_v58 = vrot.slane %v1436_v50, %v3837_v25  ;;  %v1451_v59 = vcombine.low %v1419_v43, %v1434_v48  ;;  %v1452_v60 = vcombine.high %v1419_v43, %v1434_v48 }
 0x3ca   : > { %v1500_v61 = vrot.slane %v1486_v53, %v3832_v15  ;;  %v1501_v62 = vcombine.low %v1478_v44, %v1493_v54  ;;  %v1502_v63 = vcombine.high %v1478_v44, %v1493_v54  ;;  %v1106_v24 = vshrl.u32 %v3931_v37, 16 }
 0x3cb   : > { %v1459_v2 = vrot.slane %v1451_v59, %v3837_v25  ;;  %v1466_v3 = vrot.slane %v1452_v60, %v3837_v25  ;;  %v1537_v4 = vcombine.low %v1443_v55, %v1450_v58  ;;  %v2760_v6 = vcombine.high %v1443_v55, %v1450_v58 }
 0x3cc   : > { %v1509_v8 = vrot.slane %v1501_v62, %v3837_v25  ;;  %v1516_v10 = vrot.slane %v1502_v63, %v3837_v25  ;;  %v1517_v11 = vcombine.low %v1485_v51, %v1500_v61  ;;  %v1518_v12 = vcombine.high %v1485_v51, %v1500_v61 }
 0x3cd   : > { %v1544_v14 = vrot.slane %v1537_v4, %v3832_v15  ;;  %v1553_v16 = vcombine.low %v1459_v2, %v1466_v3  ;;  %v1552_v19 = vrot.slane %v2760_v6, %v3832_v15  ;;  %v2761_v20 = vcombine.high %v1459_v2, %v1466_v3 }
 0x3ce   : > { %v1525_v17 = vrot.slane %v1517_v11, %v3837_v25  ;;  %v1532_v18 = vrot.slane %v1518_v12, %v3837_v25  ;;  %2850 = vmatmul.mubr.msk.bf16.vlgmr.msra.gmra.mrb[4].mxu1 %vm1666_vm1, %v1105_v52  ;;  %v1587_v23 = vcombine.low %v1509_v8, %v1516_v10  ;;  %v2762_v27 = vcombine.high %v1509_v8, %v1516_v10  ;;  %v2764_v11 = vld [vmem:[%s400_s16] ss:$0 sm:$0xff]  ;;  %s3317_s16 = sshll.u32 %s3418_s15, 4  ;;  %s3318_s16 = int_to_ptr.vmem [resolvable:$false] %s3317_s16 }
 0x3cf   : > { %2854 = vmatpush3.bf16.xpose.msra.mxu1 %v1718_v1  ;;  %2855 = vmatprep.mubr.msk.bf16.mxu1 %vm3410_vm0, %v3408_v7  ;;  %v1560_v32 = vrot.slane %v1553_v16, %v3832_v15  ;;  %v1568_v36 = vrot.slane %v2761_v20, %v3832_v15  ;;  %v1569_v39 = vcombine.low %v1544_v14, %v1552_v19  ;;  %v1380_v37 = vshrl.u32 %v1369_v30, 16  ;;  %s3319_s13 = scalar_lea.vmem %s3318_s16, 512 }
 0x3d0   : > { %v1603_v31 = vcombine.low %v1525_v17, %v1532_v18  ;;  %v2763_v33 = vcombine.high %v1525_v17, %v1532_v18  ;;  %2859 = vmatprep.subr.bf16.mxu1 %v3408_v7  ;;  %v1378_v26 = vpack.i.b16 %v1369_v30, %v1319_v35  ;;  %v1594_v40 = vrot.slane %v1587_v23, %v3832_v15 }
 0x3d1   : > { %v1602_v41 = vrot.slane %v2762_v27, %v3832_v15  ;;  %v1577_v42 = vcombine.low %v1560_v32, %v1568_v36  ;;  %v1108_v44 = vpack.i.b16 %v1107_v34, %v1106_v24  ;;  %v1576_v46 = vrot.slane %v1569_v39, %v3837_v25 }
 0x3d2   : > { %v1610_v43 = vrot.slane %v1603_v31, %v3832_v15  ;;  %v1618_v38 = vrot.slane %v2763_v33, %v3832_v15  ;;  %v1765_v13 = vsel %vm1666_vm1, %v1378_v26, 0  ;;  %v1102_v48 = vcombine.high %v3922_v28, %v3925_v29 }
 0x3d3   : > { %v1619_v45 = vcombine.low %v1594_v40, %v1602_v41  ;;  %v1584_v5 = vrot.slane %v1577_v42, %v3837_v25  ;;  %v1379_v50 = vshrl.u32 %v1319_v35, 16  ;;  %v1052_v53 = vcombine.high %v3914_v22, %v3911_v21 }
 0x3d4   : > { %v1627_v47 = vcombine.low %v1610_v43, %v1618_v38  ;;  %v1113_v3 = vshrl.u32 %v1102_v48, 16  ;;  %vm1662_vm2 = vcmp.eq.s32.totalorder %v3890_v56, %v2764_v11  ;;  %vm1663_vm3 = vcmp.eq.s32.totalorder %v3892_v57, %v2764_v11 }
 0x3d5   : > { %v3983_v49 = vcombine.high %v1576_v46, %v1584_v5  ;;  %v1626_v51 = vrot.slane %v1619_v45, %v3837_v25  ;;  %v1381_v54 = vpack.i.b16 %v1380_v37, %v1379_v50  ;;  %v1585_v55 = vcombine.low %v1576_v46, %v1584_v5 }
 0x3d6   : > { %2856 = vmatmul.mubr.msk.bf16.vlgmr.msra.gmra.mrb[8].mxu1 %vm1666_vm1, %v1108_v44  ;;  %v1634_v52 = vrot.slane %v1627_v47, %v3837_v25  ;;  %v1111_v60 = vpack.i.b16 %v1102_v48, %v1052_v53  ;;  %v1112_v6 = vshrl.u32 %v1052_v53, 16  ;;  %v3416_v12 = vmov -1e+30  }
 0x3d7   : > { %2860 = vmatpush3.bf16.xpose.msra.mxu1 %v1765_v13  ;;  %2861 = vmatprep.mubr.msk.bf16.mxu1 %vm3410_vm0, %v3408_v7  ;;  %v1646_v28 = vshrl.u32 %v3983_v49, 16  ;;  %v1812_v0 = vsel %vm1666_vm1, %v1381_v54, 0  ;;  %v1640_v22 = vshrl.u32 %v1585_v55, 16  ;;  %v1664_v14 = vsel %vm1662_vm2, 0.0, %v3416_v12 }
 0x3d8   : > { %2865 = vmatprep.subr.bf16.mxu1 %v3408_v7  ;;  %v1635_v58 = vcombine.low %v1626_v51, %v1634_v52  ;;  %v3990_v59 = vcombine.high %v1626_v51, %v1634_v52  ;;  %v1114_v8 = vpack.i.b16 %v1113_v3, %v1112_v6  ;;  %v1665_v16 = vsel %vm1663_vm3, 0.0, %v3416_v12 }
 0x3da   : > { %v1639_v29 = vpack.i.b16 %v1635_v58, %v1585_v55  ;;  %v1641_v61 = vshrl.u32 %v1635_v58, 16  ;;  %v1645_v62 = vpack.i.b16 %v3990_v59, %v3983_v49  ;;  %v1647_v63 = vshrl.u32 %v3990_v59, 16 }
 0x3dc   : > { %v1906_v21 = vsel %vm1666_vm1, %v1639_v29, 1065369472  ;;  %v3999_v2 = vpack.i.b16 %v1647_v63, %v1646_v28  ;;  %v1642_v4 = vpack.i.b16 %v1641_v61, %v1640_v22 }
 0x3dd   : > { %2872 = vmatpush3.bf16.msra.mxu0 %v1906_v21 }
 0x3de   : > { %2862 = vmatmul.mubr.msk.bf16.vlgmr.msra.gmra.mrb[12].mxu1 %vm1666_vm1, %v1111_v60  ;;  %2883 = vmatprep.subr.bf16.mxu0 %v3408_v7  ;;  %v1909_v10 = vsel %vm1666_vm1, %v1642_v4, 1065369472  ;;  %v1915_v49 = vsel %vm1666_vm1, %v3999_v2, 1065369472 }
 0x3df   : > { %2866 = vmatpush3.bf16.xpose.msra.mxu1 %v1812_v0  ;;  %2867 = vmatprep.mubr.msk.bf16.mxu1 %vm3410_vm0, %v3408_v7 }
 0x3e0   : > { %2877 = vmatprep.subr.bf16.mxu1 %v3408_v7 }
 0x3e6   : > { %2868 = vmatmul.mubr.msk.bf16.vlgmr.msra.gmra.mrb[16].mxu1 %vm1666_vm1, %v1114_v8  ;;  %v1912_v8 = vsel %vm1666_vm1, %v1645_v62, 1065369472 }
 0x3e7   : > { %2878 = vmatpush3.bf16.msra.mxu1 %v1909_v10  ;;  %2879 = vmatprep.mubr.msk.bf16.mxu1 %vm3410_vm0, %v3408_v7 }
 0x3e8   : > { %2889 = vmatprep.subr.bf16.mxu1 %v3408_v7 }
 0x4a1   : > { %v1707_v17 = vpop.f32.mrb[4].mxu1 }
 0x4a2   : > { %v1708_v18 = vadd.f32 %v1707_v17, %v1664_v14  ;;  %v2851_v19 = vpop.f32.mrb[5].mxu1 }
 0x4a3   : > { %v1710_v20 = vpop.f32.mrb[6].mxu1 }
 0x4a4   : > { %v1711_v23 = vadd.f32 %v1710_v20, %v1665_v16  ;;  %v2852_v27 = vpop.f32.mrb[7].mxu1  ;;  %v1856_v1 = vsel %vm1855_vm4, %v1708_v18, -inf  ;;  %v3417_v20 = vmov 32  }
 0x4a5   : > { %1857 = vmax.xlane.f32.xlu1 %v1856_v1  ;;  %3035 = vset.pattern.permute.xlu0 %v3417_v20 }
 0x4a6   : > { %v1859_v30 = vsel %vm1855_vm4, %v1711_v23, -inf  ;;  %3036 = vset.pattern.permute.xlu1 %v3417_v20 }
 0x4a7   : > { %1860 = vmax.xlane.f32.xlu0 %v1859_v30 }
 0x4a9   : > { %v1754_v31 = vpop.f32.mrb[8].mxu1 }
 0x4aa   : > { %v1755_v56 = vadd.f32 %v1754_v31, %v1664_v14  ;;  %v2857_v32 = vpop.f32.mrb[9].mxu1 }
 0x4ab   : > { %v1757_v57 = vpop.f32.mrb[10].mxu1 }
 0x4ac   : > { %v1758_v33 = vadd.f32 %v1757_v57, %v1665_v16  ;;  %v2858_v34 = vpop.f32.mrb[11].mxu1  ;;  %v1862_v35 = vsel %vm1855_vm4, %v1755_v56, -inf }
 0x4ad   : > { %1863 = vmax.xlane.f32.xlu0 %v1862_v35 }
 0x4ae   : > { %v1865_v36 = vsel %vm1855_vm4, %v1758_v33, -inf }
 0x4b1   : > { %v1801_v39 = vpop.f32.mrb[12].mxu1  ;;  %1866 = vmax.xlane.f32.xlu0 %v1865_v36 }
 0x4b2   : > { %v1802_v24 = vadd.f32 %v1801_v39, %v1664_v14  ;;  %v2863_v26 = vpop.f32.mrb[13].mxu1 }
 0x4b3   : > { %v1804_v40 = vpop.f32.mrb[14].mxu1 }
 0x4b4   : > { %v1805_v41 = vadd.f32 %v1804_v40, %v1665_v16  ;;  %v2864_v42 = vpop.f32.mrb[15].mxu1  ;;  %v1868_v43 = vsel %vm1855_vm4, %v1802_v24, -inf }
 0x4b5   : > { %1869 = vmax.xlane.f32.xlu1 %v1868_v43 }
 0x4b6   : > { %v1871_v44 = vsel %vm1855_vm4, %v1805_v41, -inf }
 0x4b7   : > { %1872 = vmax.xlane.f32.xlu0 %v1871_v44 }
 0x4b9   : > { %v1848_v38 = vpop.f32.mrb[16].mxu1 }
 0x4ba   : > { %v1849_v45 = vadd.f32 %v1848_v38, %v1664_v14  ;;  %v2869_v46 = vpop.f32.mrb[17].mxu1 }
 0x4bb   : > { %v1851_v5 = vpop.f32.mrb[18].mxu1 }
 0x4bc   : > { %v1852_v13 = vadd.f32 %v1851_v5, %v1665_v16  ;;  %v2870_v37 = vpop.f32.mrb[19].mxu1  ;;  %v1874_v47 = vsel %vm1855_vm4, %v1849_v45, -inf  ;;  %v3069_v5 = vld [vmem:[%s4166_s8] sm:$0xff]  }
 0x4bd   : > { %1875 = vmax.xlane.f32.xlu0 %v1874_v47  ;;  %v3071_v37 = vld [vmem:[%s4166_s8 + $0x10] sm:$0xff]   ;;  %v3072_v47 = vld [vmem:[%s4166_s8 + $0x18] sm:$0xff]  }
 0x4be   : > { %v1877_v48 = vsel %vm1855_vm4, %v1852_v13, -inf }
 0x4bf   : > { %1878 = vmax.xlane.f32.xlu1 %v1877_v48  ;;  %v3073_v48 = vld [vmem:[%s4166_s8 + $0x20] sm:$0xff]  }
 0x532   : > { %v1858_v50 = vpop.xlane.xlu1 %1857 }
 0x533   : > { %v1880_v52 = vsub.f32 %v1708_v18, %v1858_v50  ;;  %v3074_v50 = vld [vmem:[%s4166_s8 + $0x28] sm:$0xff]  }
 0x534   : > { %v1861_v51 = vpop.xlane.xlu0 %1860 }
 0x535   : > { %v1881_v53 = vsub.f32 %v1711_v23, %v1861_v51 }
 0x537   : > { %v1888_v54 = vpack.c.bf16 %v1881_v53, %v1880_v52 }
 0x539   : > { %v1893_v55 = vmul.bf16 1069105081, %v1888_v54 }
 0x53a   : > { %v1864_v58 = vpop.xlane.xlu0 %1863 }
 0x53b   : > { %3089 = vpow.bf16 %v1893_v55  ;;  %v1882_v28 = vsub.f32 %v1755_v56, %v1864_v58 }
 0x53e   : > { %v1867_v60 = vpop.xlane.xlu0 %1866 }
 0x53f   : > { %v1883_v29 = vsub.f32 %v1758_v33, %v1867_v60 }
 0x541   : > { %v1889_v61 = vpack.c.bf16 %v1883_v29, %v1882_v28 }
 0x542   : > { %v1870_v63 = vpop.xlane.xlu1 %1869 }
 0x543   : > { %v1896_v0 = vmul.bf16 1069105081, %v1889_v61  ;;  %v1884_v22 = vsub.f32 %v1802_v24, %v1870_v63 }
 0x544   : > { %v1873_v21 = vpop.xlane.xlu0 %1872 }
 0x545   : > { %3091 = vpow.bf16 %v1896_v0  ;;  %v1885_v3 = vsub.f32 %v1805_v41, %v1873_v21 }
 0x546   : > { %v3090_v4 = vpop.eup %3089 }
 0x547   : > { %v1890_v6 = vpack.c.bf16 %v1885_v3, %v1884_v22  ;;  %2874 = vmatmul.mubr.msk.bf16.vlgmr.msra.gmra.mrb[4].mxu0 %vm1855_vm4, %v3090_v4 }
 0x548   : > { %2884 = vmatpush3.bf16.msra.mxu0 %v1912_v8  ;;  %2885 = vmatprep.mubr.msk.bf16.mxu0 %vm3410_vm0, %v3408_v7 }
 0x549   : > { %v1899_v10 = vmul.bf16 1069105081, %v1890_v6  ;;  %2895 = vmatprep.subr.bf16.mxu0 %v3408_v7 }
 0x54a   : > { %v1876_v11 = vpop.xlane.xlu0 %1875 }
 0x54b   : > { %3093 = vpow.bf16 %v1899_v10  ;;  %v1886_v14 = vsub.f32 %v1849_v45, %v1876_v11 }
 0x54c   : > { %v1879_v12 = vpop.xlane.xlu1 %1878 }
 0x54d   : > { %v1887_v16 = vsub.f32 %v1852_v13, %v1879_v12  ;;  %v3070_v13 = vld [vmem:[%s4166_s8 + $0x8] sm:$0xff]  }
 0x54f   : > { %v1891_v17 = vpack.c.bf16 %v1887_v16, %v1886_v14 }
 0x550   : > { %v3092_v18 = vpop.eup %3091 }
 0x551   : > { %v1902_v19 = vmul.bf16 1069105081, %v1891_v17  ;;  %2880 = vmatmul.mubr.msk.bf16.vlgmr.msra.gmra.mrb[20].mxu1 %vm1855_vm4, %v3092_v18 }
 0x552   : > { %2890 = vmatpush3.bf16.msra.mxu1 %v1915_v49  ;;  %2891 = vmatprep.mubr.msk.bf16.mxu1 %vm3410_vm0, %v3408_v7 }
 0x553   : > { %3095 = vpow.bf16 %v1902_v19 }
 0x556   : > { %v3094_v59 = vpop.eup %3093 }
 0x557   : > { %2886 = vmatmul.mubr.msk.bf16.vlgmr.msra.gmra.mrb[8].mxu0 %vm1855_vm4, %v3094_v59 }
 0x558   : > { %2911 = vmatprep.mubr.msk.bf16.mxu0 %vm3410_vm0, %v3408_v7  ;;  %2896 = vmatpush3.bf16.msra.mxu0 %v3069_v5 }
 0x559   : > { %2897 = vmatprep.subr.bf16.mxu0 %v3408_v7 }
 0x55c   : > { %2898 = vmatpush3.bf16.msra.mxu0 %v3070_v13 }
 0x55d   : > { %2899 = vmatprep.subr.bf16.mxu0 %v3408_v7 }
 0x55e   : > { %v3096_v62 = vpop.eup %3095 }
 0x55f   : > { %2892 = vmatmul.mubr.msk.bf16.vlgmr.msra.gmra.mrb[24].mxu1 %vm1855_vm4, %v3096_v62 }
 0x560   : > { %2900 = vmatpush3.bf16.msra.mxu0 %v3071_v37 }
 0x561   : > { %2901 = vmatprep.subr.bf16.mxu0 %v3408_v7 }
 0x564   : > { %2902 = vmatpush3.bf16.msra.mxu0 %v3072_v47 }
 0x565   : > { %2903 = vmatprep.subr.bf16.mxu0 %v3408_v7 }
 0x568   : > { %2904 = vmatpush3.bf16.msra.mxu0 %v3073_v48 }
 0x569   : > { %2905 = vmatprep.subr.bf16.mxu0 %v3408_v7 }
 0x56c   : > { %2906 = vmatpush3.bf16.msra.mxu0 %v3074_v50 }
 0x56d   : > { %2907 = vmatprep.subr.bf16.mxu0 %v3408_v7 }
 0x61a   : > { %v1954_v23 = vpop.f32.mrb[4].mxu0 }
 0x61b   : > { %3097 = vrcp.f32 %v1954_v23  ;;  %v2875_v2 = vpop.f32.mrb[5].mxu0 }
 0x61c   : > { %v1957_v27 = vpop.f32.mrb[6].mxu0 }
 0x61d   : > { %3099 = vrcp.f32 %v1957_v27  ;;  %v2876_v1 = vpop.f32.mrb[7].mxu0 }
 0x624   : > { %v1998_v30 = vpop.f32.mrb[20].mxu1 }
 0x625   : > { %v3098_v31 = vpop.eup %3097  ;;  %3101 = vrcp.f32 %v1998_v30  ;;  %v2881_v56 = vpop.f32.mrb[21].mxu1 }
 0x626   : > { %v2001_v32 = vpop.f32.mrb[22].mxu1  ;;  %2103 = vperm.xlu0 %3035, %v3098_v31  }
 0x627   : > { %v3100_v57 = vpop.eup %3099  ;;  %v2882_v33 = vpop.f32.mrb[23].mxu1  ;;  %3103 = vrcp.f32 %v2001_v32 }
 0x628   : > { %2108 = vperm.xlu1 %3036, %v3100_v57  }
 0x62a   : > { %v2042_v34 = vpop.f32.mrb[8].mxu0 }
 0x62b   : > { %v2887_v35 = vpop.f32.mrb[9].mxu0  ;;  %3105 = vrcp.f32 %v2042_v34 }
 0x62c   : > { %v2045_v36 = vpop.f32.mrb[10].mxu0 }
 0x62d   : > { %v2888_v39 = vpop.f32.mrb[11].mxu0  ;;  %3107 = vrcp.f32 %v2045_v36 }
 0x62f   : > { %v3102_v24 = vpop.eup %3101 }
 0x630   : > { %2113 = vperm.xlu1 %3036, %v3102_v24  }
 0x631   : > { %v3104_v40 = vpop.eup %3103 }
 0x632   : > { %v2086_v26 = vpop.f32.mrb[24].mxu1 }
 0x633   : > { %v2893_v41 = vpop.f32.mrb[25].mxu1  ;;  %3109 = vrcp.f32 %v2086_v26 }
 0x634   : > { %2118 = vperm.xlu1 %3036, %v3104_v40   ;;  %v2089_v42 = vpop.f32.mrb[26].mxu1 }
 0x635   : > { %v2894_v43 = vpop.f32.mrb[27].mxu1  ;;  %v3106_v44 = vpop.eup %3105  ;;  %3111 = vrcp.f32 %v2089_v42 }
 0x637   : > { %v3108_v38 = vpop.eup %3107 }
 0x638   : > { %2123 = vperm.xlu1 %3036, %v3106_v44  }
 0x63c   : > { %2128 = vperm.xlu1 %3036, %v3108_v38  }
 0x63d   : > { %v3110_v45 = vpop.eup %3109 }
 0x63f   : > { %v3112_v46 = vpop.eup %3111 }
 0x640   : > { %2133 = vperm.xlu1 %3036, %v3110_v45  }
 0x644   : > { %2138 = vperm.xlu1 %3036, %v3112_v46  }
 0x6a5   : > { %v2104_v51 = vpop.permute.xlu0 %2103 }
 0x6a6   : > { %v2141_v53 = vmul.f32 %v2104_v51, %v1954_v23 }
 0x6a7   : > { %v2109_v52 = vpop.permute.xlu1 %2108 }
 0x6a8   : > { %v2142_v54 = vmul.f32 %v2109_v52, %v1957_v27 }
 0x6aa   : > { %v2149_v55 = vpack.c.bf16 %v2142_v54, %v2141_v53  ;;  %v3075_v54 = vld [vmem:[%s4166_s8 + $0x30] sm:$0xff]  }
 0x6ab   : > { %2908 = vmatpush3.bf16.msra.mxu0 %v3075_v54 }
 0x6ac   : > { %v2157_v0 = vshrl.u32 %v2149_v55, 16  ;;  %2909 = vmatprep.subr.bf16.mxu0 %v3408_v7 }
 0x6af   : > { %v2114_v58 = vpop.permute.xlu1 %2113 }
 0x6b0   : > { %v2143_v28 = vmul.f32 %v2114_v58, %v1998_v30 }
 0x6b3   : > { %v2119_v60 = vpop.permute.xlu1 %2118 }
 0x6b4   : > { %v2144_v29 = vmul.f32 %v2119_v60, %v2001_v32 }
 0x6b6   : > { %v2150_v61 = vpack.c.bf16 %v2144_v29, %v2143_v28 }
 0x6b7   : > { %v2124_v63 = vpop.permute.xlu1 %2123 }
 0x6b8   : > { %v2155_v21 = vpack.i.b16 %v2150_v61, %v2149_v55  ;;  %v2158_v22 = vshrl.u32 %v2150_v61, 16  ;;  %v2145_v6 = vmul.f32 %v2124_v63, %v2042_v34 }
 0x6ba   : > { %v2159_v3 = vpack.i.b16 %v2158_v22, %v2157_v0  ;;  %v2169_v18 = vcombine.high %v2155_v21, %v3830_v9  ;;  %v2176_v62 = vrot.slane %v2155_v21, %v3832_v15  ;;  %v3076_v21 = vld [vmem:[%s4166_s8 + $0x38] sm:$0xff]  }
 0x6bb   : > { %v2129_v4 = vpop.permute.xlu1 %2128  ;;  %2910 = vmatpush3.bf16.msra.mxu0 %v3076_v21 }
 0x6bc   : > { %v2146_v8 = vmul.f32 %v2129_v4, %v2045_v36  ;;  %v2183_v27 = vrot.slane %v2169_v18, %v3832_v15  ;;  %v2235_v1 = vcombine.high %v2159_v3, %v3830_v9  ;;  %v2242_v57 = vrot.slane %v2159_v3, %v3832_v15 }
 0x6be   : > { %v2151_v10 = vpack.c.bf16 %v2146_v8, %v2145_v6  ;;  %v2249_v24 = vrot.slane %v2235_v1, %v3832_v15 }
 0x6bf   : > { %v2134_v11 = vpop.permute.xlu1 %2133 }
 0x6c0   : > { %v2147_v14 = vmul.f32 %v2134_v11, %v2086_v26  ;;  %v2165_v19 = vshrl.u32 %v2151_v10, 16 }
 0x6c3   : > { %v2139_v12 = vpop.permute.xlu1 %2138 }
 0x6c4   : > { %v2148_v16 = vmul.f32 %v2139_v12, %v2089_v42 }
 0x6c6   : > { %v2152_v17 = vpack.c.bf16 %v2148_v16, %v2147_v14 }
 0x6c8   : > { %v2163_v49 = vpack.i.b16 %v2152_v17, %v2151_v10  ;;  %v2166_v59 = vshrl.u32 %v2152_v17, 16 }
 0x6ca   : > { %v2167_v20 = vpack.i.b16 %v2166_v59, %v2165_v19  ;;  %v2184_v23 = vcombine.high %v2163_v49, %v3830_v9  ;;  %v2191_v2 = vrot.slane %v2163_v49, %v3832_v15 }
 0x6cc   : > { %v2198_v30 = vrot.slane %v2184_v23, %v3832_v15  ;;  %v2199_v31 = vcombine.low %v2176_v62, %v2191_v2  ;;  %v2200_v56 = vcombine.high %v2176_v62, %v2191_v2  ;;  %v2250_v32 = vcombine.high %v2167_v20, %v3830_v9 }
 0x6cd   : > { %v2257_v33 = vrot.slane %v2167_v20, %v3832_v15 }
 0x6ce   : > { %v2207_v34 = vrot.slane %v2199_v31, %v3837_v25  ;;  %v2214_v35 = vrot.slane %v2200_v56, %v3837_v25  ;;  %v2215_v36 = vcombine.low %v2183_v27, %v2198_v30  ;;  %v2216_v39 = vcombine.high %v2183_v27, %v2198_v30 }
 0x6cf   : > { %v2264_v26 = vrot.slane %v2250_v32, %v3832_v15  ;;  %v2265_v40 = vcombine.low %v2242_v57, %v2257_v33  ;;  %v2266_v41 = vcombine.high %v2242_v57, %v2257_v33 }
 0x6d0   : > { %v2223_v42 = vrot.slane %v2215_v36, %v3837_v25  ;;  %v2230_v9 = vrot.slane %v2216_v39, %v3837_v25  ;;  %v2301_v43 = vcombine.low %v2207_v34, %v2214_v35  ;;  %v2773_v44 = vcombine.high %v2207_v34, %v2214_v35 }
 0x6d1   : > { %v2273_v38 = vrot.slane %v2265_v40, %v3837_v25  ;;  %v2280_v45 = vrot.slane %v2266_v41, %v3837_v25  ;;  %v2281_v46 = vcombine.low %v2249_v24, %v2264_v26  ;;  %v2282_v5 = vcombine.high %v2249_v24, %v2264_v26 }
 0x6d2   : > { %v2308_v13 = vrot.slane %v2301_v43, %v3832_v15  ;;  %v2316_v37 = vrot.slane %v2773_v44, %v3832_v15  ;;  %v2317_v47 = vcombine.low %v2223_v42, %v2230_v9  ;;  %v2774_v48 = vcombine.high %v2223_v42, %v2230_v9 }
 0x6d3   : > { %v2289_v50 = vrot.slane %v2281_v46, %v3837_v25  ;;  %v2296_v51 = vrot.slane %v2282_v5, %v3837_v25  ;;  %v2351_v52 = vcombine.low %v2273_v38, %v2280_v45  ;;  %v2775_v53 = vcombine.high %v2273_v38, %v2280_v45 }
 0x6d4   : > { %v2324_v55 = vrot.slane %v2317_v47, %v3832_v15  ;;  %v2332_v58 = vrot.slane %v2774_v48, %v3832_v15  ;;  %v2333_v60 = vcombine.low %v2308_v13, %v2316_v37 }
 0x6d5   : > { %v2358_v28 = vrot.slane %v2351_v52, %v3832_v15  ;;  %v2366_v29 = vrot.slane %v2775_v53, %v3832_v15  ;;  %v2367_v61 = vcombine.low %v2289_v50, %v2296_v51  ;;  %v2776_v63 = vcombine.high %v2289_v50, %v2296_v51 }
 0x6d6   : > { %v2341_v0 = vcombine.low %v2324_v55, %v2332_v58  ;;  %v2340_v6 = vrot.slane %v2333_v60, %v3837_v25 }
 0x6d7   : > { %v2374_v22 = vrot.slane %v2367_v61, %v3832_v15  ;;  %v2382_v3 = vrot.slane %v2776_v63, %v3832_v15  ;;  %v2383_v4 = vcombine.low %v2358_v28, %v2366_v29 }
 0x6d8   : > { %v2348_v8 = vrot.slane %v2341_v0, %v3837_v25 }
 0x6d9   : > { %v2391_v10 = vcombine.low %v2374_v22, %v2382_v3  ;;  %v2390_v14 = vrot.slane %v2383_v4, %v3837_v25 }
 0x6da   : > { %v2350_v11 = vcombine.high %v2340_v6, %v2348_v8  ;;  %v2349_v12 = vcombine.low %v2340_v6, %v2348_v8 }
 0x6db   : > { %v2398_v7 = vrot.slane %v2391_v10, %v3837_v25 }
 0x6dc   : > { %v2404_v18 = vshrl.u32 %v2349_v12, 16  ;;  %v2410_v19 = vshrl.u32 %v2350_v11, 16 }
 0x6dd   : > { %v2400_v16 = vcombine.high %v2390_v14, %v2398_v7  ;;  %v2399_v17 = vcombine.low %v2390_v14, %v2398_v7 }
 0x6df   : > { %v2409_v49 = vpack.i.b16 %v2400_v16, %v2350_v11  ;;  %v2405_v59 = vshrl.u32 %v2399_v17, 16  ;;  %v2411_v15 = vshrl.u32 %v2400_v16, 16  ;;  %v2403_v62 = vpack.i.b16 %v2399_v17, %v2349_v12 }
 0x6e1   : > { %2415 = vrot.lane.b32.xlu0 %v2409_v49, %s3411_s3  ;;  %v2406_v20 = vpack.i.b16 %v2405_v59, %v2404_v18  ;;  %v2412_v23 = vpack.i.b16 %v2411_v15, %v2410_v19  ;;  %s463_s3 = scalar_lea.vmem [#allocation14], %s2715_s22 }
 0x6e2   : > { %s2550_s29 = sshll.u32 %s463_s3, 4  ;;  %s4109_s29 = int_to_ptr.vmem [resolvable:$true] %s2550_s29 }
 0x6e3   : > { %2413 = vrot.lane.b32.xlu1 %v2406_v20, %s3413_s26  ;;  %s3313_s22 = scalar_lea.vmem %s4109_s29, 256  ;;  %p3320_p9 = scmp.lt.s32.totalorder %s4109_s29, %s3318_s16 }
 0x6e4   : > { %p3314_p2 = scmp.ne.s32.totalorder %s4109_s29, %s3313_s22  ;;  %p3321_p3 = scmp.lt.s32.totalorder %s3319_s13, %s3313_s22 }
 0x6e6   : > { %p3315_p11 = pnand %p3314_p2, %p4201_p6  ;;  %p3322_p7 = por %p3321_p3, %p3320_p9 }
 0x6e7   : > { %2417 = vrot.lane.b32.xlu1 %v2412_v23, %s3412_s23 }
 0x6e8   : > { %p3316_p5 = pneg %p3315_p11 }
 0x6ea   : > { %p3323_p12 = pnand %p3322_p7, %p3316_p5 }
 0x753   : > { %v2416_v27 = vpop.permute.xlu0 %2415 }
 0x755   : > { %v2414_v2 = vpop.permute.xlu1 %2413 }
 0x756   : > { %v2421_v25 = vsel %vm1666_vm1, %v2403_v62, %v2414_v2 }
 0x757   : > { %v2424_v30 = vsel %vm2422_vm5, %v2421_v25, %v2416_v27 }
 0x759   : > { %v2418_v1 = vpop.permute.xlu1 %2417 }
 0x75a   : > { %v2427_v31 = vsel %vm2425_vm6, %v2424_v30, %v2418_v1 }
 0x75b   : > { %2912 = vmatmul.mubr.bf16.vlgmr.msra.gmra.mrb[12].mxu0 %v2427_v31 }
 0x82e   : > { %v2527_v56 = vpop.f32.mrb[12].mxu0 }
 0x82f   : > { %2534 = vst [vmem:[%s463_s3] sm:$0xff] %v2527_v56  ;;  %v2913_v32 = vpop.f32.mrb[13].mxu0 }
 0x830   : > { %v2530_v57 = vpop.f32.mrb[14].mxu0 }
 0x831   : > { %2535 = vst [vmem:[%s463_s3 + $0x8] sm:$0xff] %v2530_v57  ;;  %v2914_v33 = vpop.f32.mrb[15].mxu0 }
 0x832   : > { %3326 = shalt.err (!%p3323_p12)
}
 0x833   : > { %s3327_s25 = scalar_lea.hbm %s4114_s5, 256  ;;  %s3331_s4 = scalar_lea.hbm %s4167_s9, 512 }
 0x834   : > { %p3328_p8 = scmp.ne.s32.totalorder %s4114_s5, %s3327_s25  ;;  %p3332_p1 = scmp.lt.u32.totalorder %s4114_s5, %s4167_s9 }
 0x835   : > { %p3333_p13 = scmp.lt.u32.totalorder %s3331_s4, %s3327_s25  ;;  %p3335_p2 = scmp.lt.u32.totalorder %s3327_s25, %s4114_s5 }
 0x836   : > { %p3329_p10 = pnand %p3328_p8, %p4201_p6 }
 0x837   : > { %p3334_p0 = por %p3333_p13, %p3332_p1 }
 0x838   : > { %p3330_p4 = pneg %p3329_p10 }
 0x839   : > { %p3336_p11 = por %p3335_p2, %p3334_p0 }
 0x83b   : > { %p3337_p5 = pnand %p3336_p11, %p3330_p4 }
 0x83d   : > { %3340 = shalt.err (!%p3337_p5)
}
 0x83e   : > { %s3419_s14 = smov 128   ;;  %s3420_s3 = smov 8  }
 0x83f   : > { %2939 = dma.vmem_to_hbm [thread:$0]  (%p4201_p6), %s4109_s29, 256, %s4114_s5, %s2537_s6, %s3419_s14, %s3419_s14, %s3420_s3  }
 0x840 PF: > { %s2565_s20 = sand.u32 1, %s3383_s30   ;;  %p4202_p9 = scmp.ne.s32.totalorder %s4189_s19, 0 }
 0x841   : > { %p4203_p3 = scmp.ge.s32.totalorder %s3395_s12, 2  ;;  %s2566_s23 = scalar_lea.sflag [#allocation4], %s2565_s20 }
 0x843   : > { %p2965_p7 = pnand %p4203_p3, %p4202_p9 }
 0x845   : > { %3378 = dma.done.wait (!%p2965_p7), %s2566_s23, 256  }
 0x846   : > { %3380 = vsyncadd (!%p2965_p7), %s2566_s23, 4294967040  ;;  %p27_p12 = scmp.ge.s32.totalorder %s3635_s21, 4   ;;  %s4204_s30 = smov %s3387_s10 }
 0x847   : > { %s4205_s10 = smov %s3391_s11  ;;  %s4206_s11 = smov %s3647_s27 }
 0x848   : > { %s4207_s12 = smov %s3635_s21  ;;  %29 = sbr.rel (!%p27_p12) target bundleno = 16 (0x10), region = 137 }
 0x84f   :  { %2571 = vsyncpa [#allocation3], 1 }
 0x850   :  { %2573 = vsyncpa [#allocation3 + $0x1], 1 }
 0x851   :  { %2574 = vsyncpa [#allocation6], 1 }
 0x852   :  { %2576 = vsyncpa [#allocation6 + $0x1], 1 }
 0x853   :  { %2577 = vsyncpa [#allocation9], 1 }
 0x854   :  { %2578 = vsyncpa [#allocation12], 1 }
 0x855   :  { %2579 = vsyncpa [#allocation4], 1 }
 0x856   :  { %2581 = vsyncpa [#allocation4 + $0x1], 1 }

</bundles_post_ra>
